<compile_context>
chip_gen: v7x
topology: tpu7x:2x2x1
jax: 0.10.0
libtpu: 0.0.40
codegen_flags: <defaults>
</compile_context>

<pallas_src>
import functools
import math

import jax
import jax.numpy as jnp
from jax.experimental import pallas as pl
from jax.experimental.pallas import tpu as pltpu

# ---------------- small synthetic GPT-2 config ----------------
VOCAB = 64
N_POS = 32
N_EMBD = 32
N_LAYER = 2
N_HEAD = 2
HEAD_DIM = N_EMBD // N_HEAD
SEQ = 8           # head / tail max_length (small stand-in for 128)
BATCH = 2
LN_EPS = 1e-5

_VMEM = pl.BlockSpec(memory_space=pltpu.MemorySpace.VMEM)


# ---------------- in-kernel math helpers (traced inside kernels) ----------------
def _layernorm(x, g, b):
    mu = jnp.mean(x, axis=-1, keepdims=True)
    var = jnp.mean(jnp.square(x - mu), axis=-1, keepdims=True)
    return (x - mu) * jax.lax.rsqrt(var + LN_EPS) * g + b


def _gelu_new(x):
    c = math.sqrt(2.0 / math.pi)
    return 0.5 * x * (1.0 + jnp.tanh(c * (x + 0.044715 * x * x * x)))


# ---------------- fused transformer block kernel ----------------
def _block_kernel(h_ref, bias_ref,
                  ln1_g_ref, ln1_b_ref, attn_w_ref, attn_b_ref,
                  proj_w_ref, proj_b_ref, ln2_g_ref, ln2_b_ref,
                  fc_w_ref, fc_b_ref, mlp_w_ref, mlp_b_ref,
                  o_ref, *, n_head):
    """One full GPT-2 block for the whole (2B, S, E) batch, fully fused in VMEM."""
    NB, S, E = h_ref.shape
    Dh = E // n_head
    scale = 1.0 / math.sqrt(Dh)

    h = h_ref[...]                                                   # (2B, S, E)
    x = h.reshape(NB * S, E)

    # ---- attention sublayer ----
    y = _layernorm(x, ln1_g_ref[...], ln1_b_ref[...])
    qkv = jnp.dot(y, attn_w_ref[...], preferred_element_type=jnp.float32)
    qkv = (qkv + attn_b_ref[...]).reshape(NB, S, 3 * E)              # (2B, S, 3E)
    bias = bias_ref[...]                                             # (2B, S, S)
    proj_w = proj_w_ref[...]                                         # (E, E)

    # Static head loop; each head's output is folded straight into the output
    # projection (sum_h a_h @ W_proj[h*Dh:(h+1)*Dh, :]) -> no transposes, no
    # lane-dim concatenation, no separate (B,H,S,Dh) tensors in HBM.
    attn_proj = None
    for hh in range(n_head):
        q = qkv[:, :, hh * Dh:(hh + 1) * Dh]                         # (2B, S, Dh)
        k = qkv[:, :, E + hh * Dh:E + (hh + 1) * Dh]
        v = qkv[:, :, 2 * E + hh * Dh:2 * E + (hh + 1) * Dh]
        s = jnp.einsum("bqd,bkd->bqk", q, k,
                       preferred_element_type=jnp.float32) * scale + bias
        s = s - jnp.max(s, axis=-1, keepdims=True)
        p = jnp.exp(s)
        p = p * pl.reciprocal(jnp.sum(p, axis=-1, keepdims=True), approx=True)
        a_h = jnp.einsum("bqk,bkd->bqd", p, v,
                         preferred_element_type=jnp.float32)         # (2B, S, Dh)
        contrib = jnp.dot(a_h.reshape(NB * S, Dh),
                          proj_w[hh * Dh:(hh + 1) * Dh, :],
                          preferred_element_type=jnp.float32)
        attn_proj = contrib if attn_proj is None else attn_proj + contrib
    x = x + attn_proj + proj_b_ref[...]                              # residual 1

    # ---- MLP sublayer ----
    y = _layernorm(x, ln2_g_ref[...], ln2_b_ref[...])
    m = jnp.dot(y, fc_w_ref[...], preferred_element_type=jnp.float32) + fc_b_ref[...]
    m = _gelu_new(m)
    m = jnp.dot(m, mlp_w_ref[...], preferred_element_type=jnp.float32) + mlp_b_ref[...]
    x = x + m                                                        # residual 2

    o_ref[...] = x.reshape(NB, S, E).astype(o_ref.dtype)


def gpt2_block(h, bias, layer):
    NB, S, E = h.shape
    return pl.pallas_call(
        functools.partial(_block_kernel, n_head=N_HEAD),
        out_shape=jax.ShapeDtypeStruct((NB, S, E), jnp.float32),
        in_specs=[_VMEM] * 14,
        out_specs=_VMEM,
    )(h, bias,
      layer["ln1_g"].reshape(1, E), layer["ln1_b"].reshape(1, E),
      layer["attn_w"], layer["attn_b"].reshape(1, 3 * E),
      layer["proj_w"], layer["proj_b"].reshape(1, E),
      layer["ln2_g"].reshape(1, E), layer["ln2_b"].reshape(1, E),
      layer["fc_w"], layer["fc_b"].reshape(1, 4 * E),
      layer["mlp_proj_w"], layer["mlp_proj_b"].reshape(1, E))


# ---------------- final LayerNorm + classifier kernel ----------------
def _cls_kernel(hfeat_ref, tfeat_ref, g_ref, b_ref, w_ref, cb_ref, o_ref):
    """ln_f on the pooled tokens + (B,2E)@(2E,1) as VPU mul + lane reduce."""
    E = hfeat_ref.shape[-1]
    hf = _layernorm(hfeat_ref[...], g_ref[...], b_ref[...])          # (B, E)
    tf = _layernorm(tfeat_ref[...], g_ref[...], b_ref[...])          # (B, E)
    w = w_ref[...]                                                   # (1, 2E)
    acc = hf * w[:, :E] + tf * w[:, E:]
    o_ref[...] = (jnp.sum(acc, axis=-1, keepdims=True) + cb_ref[...]).astype(o_ref.dtype)


def classifier_head(head_feat, tail_feat, lnf_g, lnf_b, cls_w, cls_b):
    B, E = head_feat.shape
    return pl.pallas_call(
        _cls_kernel,
        out_shape=jax.ShapeDtypeStruct((B, 1), jnp.float32),
        in_specs=[_VMEM] * 6,
        out_specs=_VMEM,
    )(head_feat, tail_feat, lnf_g.reshape(1, E), lnf_b.reshape(1, E),
      cls_w.reshape(1, 2 * E), cls_b.reshape(1, 1))


# ---------------- head/tail classifier forward ----------------
def headtail_forward(params, head_input_ids, head_attention_mask,
                     tail_input_ids, tail_attention_mask):
    B, S = head_input_ids.shape
    # head & tail share the transformer -> one pass over batch 2B.
    ids = jnp.concatenate([head_input_ids, tail_input_ids], axis=0)          # (2B, S)
    mask = jnp.concatenate([head_attention_mask, tail_attention_mask], axis=0)

    pos_ids = jnp.arange(S, dtype=jnp.int32)[None, :]
    h = params["wte"][ids] + params["wpe"][pos_ids]                          # (2B, S, E)
    # embd dropout -> identity (inference)

    # causal + key-padding additive bias, built once and reused by every block.
    causal = jnp.tril(jnp.ones((S, S), dtype=bool))
    allowed = jnp.logical_and(causal[None, :, :], mask[:, None, :].astype(bool))
    bias = jnp.where(allowed, 0.0, -1e9).astype(jnp.float32)                 # (2B, S, S)
    # NOTE: fully-masked query rows (left-padded tails) yield a uniform softmax;
    # those positions are never read by the pooling below.

    for layer in params["layers"]:
        h = gpt2_block(h, bias, layer)

    # Pooling index per the PyTorch reference: attention_mask.sum(dim=1) - 1
    # (kept verbatim, including its behaviour for left-padded tails).
    idx = jnp.sum(mask, axis=1).astype(jnp.int32) - 1                        # (2B,)
    feats = h[jnp.arange(2 * B), idx]                                        # (2B, E)
    # ln_f is per-token, so applying it after the gather (inside the classifier
    # kernel) is exact and only normalizes the tokens that are actually used.
    head_feat, tail_feat = feats[:B], feats[B:]

    # resid_pdrop dropout -> identity (inference)
    logits = classifier_head(head_feat, tail_feat,
                             params["lnf_g"], params["lnf_b"],
                             params["cls_w"], params["cls_b"])               # (B, 1)
    return logits


# ---------------- deterministic parameter init ----------------
def init_params(key):
    std = 0.02
    keys = jax.random.split(key, 3 + N_LAYER)
    params = {
        "wte": std * jax.random.normal(keys[0], (VOCAB, N_EMBD), jnp.float32),
        "wpe": std * jax.random.normal(keys[1], (N_POS, N_EMBD), jnp.float32),
        "lnf_g": jnp.ones((N_EMBD,), jnp.float32),
        "lnf_b": jnp.zeros((N_EMBD,), jnp.float32),
        # nn.Linear(2E, 1): store transposed weight (2E, 1)
        "cls_w": std * jax.random.normal(keys[2], (2 * N_EMBD, 1), jnp.float32),
        "cls_b": jnp.zeros((1,), jnp.float32),
        "layers": [],
    }
    for l in range(N_LAYER):
        k = jax.random.split(keys[3 + l], 4)
        params["layers"].append({
            "ln1_g": jnp.ones((N_EMBD,), jnp.float32),
            "ln1_b": jnp.zeros((N_EMBD,), jnp.float32),
            "attn_w": std * jax.random.normal(k[0], (N_EMBD, 3 * N_EMBD), jnp.float32),
            "attn_b": jnp.zeros((3 * N_EMBD,), jnp.float32),
            "proj_w": std * jax.random.normal(k[1], (N_EMBD, N_EMBD), jnp.float32),
            "proj_b": jnp.zeros((N_EMBD,), jnp.float32),
            "ln2_g": jnp.ones((N_EMBD,), jnp.float32),
            "ln2_b": jnp.zeros((N_EMBD,), jnp.float32),
            "fc_w": std * jax.random.normal(k[2], (N_EMBD, 4 * N_EMBD), jnp.float32),
            "fc_b": jnp.zeros((4 * N_EMBD,), jnp.float32),
            "mlp_proj_w": std * jax.random.normal(k[3], (4 * N_EMBD, N_EMBD), jnp.float32),
            "mlp_proj_b": jnp.zeros((N_EMBD,), jnp.float32),
        })
    return params


if __name__ == "__main__":
    root = jax.random.PRNGKey(0)
    k_params, k_head, k_tail = jax.random.split(root, 3)
    params = init_params(k_params)

    head_input_ids = jax.random.randint(k_head, (BATCH, SEQ), 0, VOCAB, jnp.int32)
    tail_input_ids = jax.random.randint(k_tail, (BATCH, SEQ), 0, VOCAB, jnp.int32)
    # head: right-padded masks; tail: sample 1 left-padded (as prepare_head_tail_inputs does)
    head_attention_mask = jnp.array([[1] * SEQ,
                                     [1] * (SEQ - 2) + [0, 0]], dtype=jnp.int32)
    tail_attention_mask = jnp.array([[1] * SEQ,
                                     [0, 0, 0] + [1] * (SEQ - 3)], dtype=jnp.int32)

    fwd = jax.jit(headtail_forward)
    logits = fwd(params, head_input_ids, head_attention_mask,
                 tail_input_ids, tail_attention_mask)
    jax.block_until_ready(logits)
    assert logits.shape == (BATCH, 1) and logits.dtype == jnp.float32
    print("KERNEL_OK")
</pallas_src>

<mosaic_0001>
module attributes {stable_mosaic.version = 11 : i64} {
  func.func @_block_kernel(%arg0: memref<4x8x32xf32, #tpu.memory_space<vmem>>, %arg1: memref<4x8x8xf32, #tpu.memory_space<vmem>>, %arg2: memref<1x32xf32, #tpu.memory_space<vmem>>, %arg3: memref<1x32xf32, #tpu.memory_space<vmem>>, %arg4: memref<32x96xf32, #tpu.memory_space<vmem>>, %arg5: memref<1x96xf32, #tpu.memory_space<vmem>>, %arg6: memref<32x32xf32, #tpu.memory_space<vmem>>, %arg7: memref<1x32xf32, #tpu.memory_space<vmem>>, %arg8: memref<1x32xf32, #tpu.memory_space<vmem>>, %arg9: memref<1x32xf32, #tpu.memory_space<vmem>>, %arg10: memref<32x128xf32, #tpu.memory_space<vmem>>, %arg11: memref<1x128xf32, #tpu.memory_space<vmem>>, %arg12: memref<128x32xf32, #tpu.memory_space<vmem>>, %arg13: memref<1x32xf32, #tpu.memory_space<vmem>>, %arg14: memref<4x8x32xf32, #tpu.memory_space<vmem>>) attributes {dimension_semantics = [], scalar_prefetch = 0 : i64, scratch_operands = 0 : i64, tpu.core_type = #tpu.core_type<tc>} {
    %c0 = arith.constant 0 : index
    %c0_0 = arith.constant 0 : index
    %c0_1 = arith.constant 0 : index
    %0 = vector.load %arg0[%c0, %c0_0, %c0_1] : memref<4x8x32xf32, #tpu.memory_space<vmem>>, vector<4x8x32xf32>
    %1 = vector.shape_cast %0 : vector<4x8x32xf32> to vector<32x32xf32>
    %c0_2 = arith.constant 0 : index
    %c0_3 = arith.constant 0 : index
    %2 = vector.load %arg2[%c0_2, %c0_3] : memref<1x32xf32, #tpu.memory_space<vmem>>, vector<1x32xf32>
    %c0_4 = arith.constant 0 : index
    %c0_5 = arith.constant 0 : index
    %3 = vector.load %arg3[%c0_4, %c0_5] : memref<1x32xf32, #tpu.memory_space<vmem>>, vector<1x32xf32>
    %cst = arith.constant dense<0.000000e+00> : vector<32xf32>
    %4 = vector.multi_reduction <add>, %1, %cst [1] : vector<32x32xf32> to vector<32xf32>
    %5 = vector.shape_cast %4 : vector<32xf32> to vector<32x1xf32>
    %cst_6 = arith.constant 3.200000e+01 : f32
    %6 = vector.broadcast %cst_6 : f32 to vector<32x1xf32>
    %7 = arith.divf %5, %6 : vector<32x1xf32>
    %8 = vector.broadcast %7 : vector<32x1xf32> to vector<32x32xf32>
    %9 = arith.subf %1, %8 : vector<32x32xf32>
    %10 = arith.mulf %9, %9 : vector<32x32xf32>
    %cst_7 = arith.constant dense<0.000000e+00> : vector<32xf32>
    %11 = vector.multi_reduction <add>, %10, %cst_7 [1] : vector<32x32xf32> to vector<32xf32>
    %12 = vector.shape_cast %11 : vector<32xf32> to vector<32x1xf32>
    %cst_8 = arith.constant 3.200000e+01 : f32
    %13 = vector.broadcast %cst_8 : f32 to vector<32x1xf32>
    %14 = arith.divf %12, %13 : vector<32x1xf32>
    %15 = vector.broadcast %7 : vector<32x1xf32> to vector<32x32xf32>
    %16 = arith.subf %1, %15 : vector<32x32xf32>
    %cst_9 = arith.constant 9.99999974E-6 : f32
    %17 = vector.broadcast %cst_9 : f32 to vector<32x1xf32>
    %18 = arith.addf %14, %17 : vector<32x1xf32>
    %19 = math.rsqrt %18 : vector<32x1xf32>
    %20 = vector.broadcast %19 : vector<32x1xf32> to vector<32x32xf32>
    %21 = arith.mulf %16, %20 : vector<32x32xf32>
    %22 = vector.broadcast %2 : vector<1x32xf32> to vector<32x32xf32>
    %23 = arith.mulf %21, %22 : vector<32x32xf32>
    %24 = vector.broadcast %3 : vector<1x32xf32> to vector<32x32xf32>
    %25 = arith.addf %23, %24 : vector<32x32xf32>
    %c0_10 = arith.constant 0 : index
    %c0_11 = arith.constant 0 : index
    %26 = vector.load %arg4[%c0_10, %c0_11] : memref<32x96xf32, #tpu.memory_space<vmem>>, vector<32x96xf32>
    %cst_12 = arith.constant dense<0.000000e+00> : vector<32x96xf32>
    %27 = tpu.matmul %25, %26, %cst_12 {dimension_numbers = #tpu.dot_dimension_numbers<[1], [0], [0], [1], [0, 0, 1, 1], [], []>} : vector<32x32xf32>, vector<32x96xf32>, vector<32x96xf32> -> vector<32x96xf32>
    %c0_13 = arith.constant 0 : index
    %c0_14 = arith.constant 0 : index
    %28 = vector.load %arg5[%c0_13, %c0_14] : memref<1x96xf32, #tpu.memory_space<vmem>>, vector<1x96xf32>
    %29 = vector.broadcast %28 : vector<1x96xf32> to vector<32x96xf32>
    %30 = arith.addf %27, %29 : vector<32x96xf32>
    %31 = vector.shape_cast %30 : vector<32x96xf32> to vector<4x8x96xf32>
    %c0_15 = arith.constant 0 : index
    %c0_16 = arith.constant 0 : index
    %c0_17 = arith.constant 0 : index
    %32 = vector.load %arg1[%c0_15, %c0_16, %c0_17] : memref<4x8x8xf32, #tpu.memory_space<vmem>>, vector<4x8x8xf32>
    %c0_18 = arith.constant 0 : index
    %c0_19 = arith.constant 0 : index
    %33 = vector.load %arg6[%c0_18, %c0_19] : memref<32x32xf32, #tpu.memory_space<vmem>>, vector<32x32xf32>
    %34 = vector.extract_strided_slice %31 {offsets = [0, 0, 0], sizes = [4, 8, 16], strides = [1, 1, 1]} : vector<4x8x96xf32> to vector<4x8x16xf32>
    %35 = vector.extract_strided_slice %31 {offsets = [0, 0, 32], sizes = [4, 8, 16], strides = [1, 1, 1]} : vector<4x8x96xf32> to vector<4x8x16xf32>
    %36 = vector.extract_strided_slice %31 {offsets = [0, 0, 64], sizes = [4, 8, 16], strides = [1, 1, 1]} : vector<4x8x96xf32> to vector<4x8x16xf32>
    "tpu.trace_start"() <{level = 10 : i32, message = "bqd,bkd->bqk"}> : () -> ()
    %cst_20 = arith.constant dense<0.000000e+00> : vector<4x8x8xf32>
    %37 = tpu.matmul %34, %35, %cst_20 {dimension_numbers = #tpu.dot_dimension_numbers<[2], [2], [1], [1], [0, 0, 0, 1, 1, 1], [0], [0]>} : vector<4x8x16xf32>, vector<4x8x16xf32>, vector<4x8x8xf32> -> vector<4x8x8xf32>
    "tpu.trace_stop"() : () -> ()
    %cst_21 = arith.constant 2.500000e-01 : f32
    %38 = vector.broadcast %cst_21 : f32 to vector<4x8x8xf32>
    %39 = arith.mulf %37, %38 : vector<4x8x8xf32>
    %40 = arith.addf %39, %32 : vector<4x8x8xf32>
    %cst_22 = arith.constant dense<0xFF800000> : vector<4x8xf32>
    %41 = vector.multi_reduction <maximumf>, %40, %cst_22 [2] : vector<4x8x8xf32> to vector<4x8xf32>
    %42 = vector.shape_cast %41 : vector<4x8xf32> to vector<4x8x1xf32>
    %43 = vector.broadcast %42 : vector<4x8x1xf32> to vector<4x8x8xf32>
    %44 = arith.subf %40, %43 : vector<4x8x8xf32>
    %45 = math.exp %44 : vector<4x8x8xf32>
    %cst_23 = arith.constant dense<0.000000e+00> : vector<4x8xf32>
    %46 = vector.multi_reduction <add>, %45, %cst_23 [2] : vector<4x8x8xf32> to vector<4x8xf32>
    %47 = vector.shape_cast %46 : vector<4x8xf32> to vector<4x8x1xf32>
    %48 = tpu.reciprocal %47 {approx = true} : vector<4x8x1xf32> -> vector<4x8x1xf32>
    %49 = vector.broadcast %48 : vector<4x8x1xf32> to vector<4x8x8xf32>
    %50 = arith.mulf %45, %49 : vector<4x8x8xf32>
    "tpu.trace_start"() <{level = 10 : i32, message = "bqk,bkd->bqd"}> : () -> ()
    %cst_24 = arith.constant dense<0.000000e+00> : vector<4x8x16xf32>
    %51 = tpu.matmul %50, %36, %cst_24 {dimension_numbers = #tpu.dot_dimension_numbers<[2], [1], [1], [2], [0, 0, 0, 1, 1, 2], [0], [0]>} : vector<4x8x8xf32>, vector<4x8x16xf32>, vector<4x8x16xf32> -> vector<4x8x16xf32>
    "tpu.trace_stop"() : () -> ()
    %52 = vector.shape_cast %51 : vector<4x8x16xf32> to vector<32x16xf32>
    %53 = vector.extract_strided_slice %33 {offsets = [0, 0], sizes = [16, 32], strides = [1, 1]} : vector<32x32xf32> to vector<16x32xf32>
    %cst_25 = arith.constant dense<0.000000e+00> : vector<32x32xf32>
    %54 = tpu.matmul %52, %53, %cst_25 {dimension_numbers = #tpu.dot_dimension_numbers<[1], [0], [0], [1], [0, 0, 1, 1], [], []>} : vector<32x16xf32>, vector<16x32xf32>, vector<32x32xf32> -> vector<32x32xf32>
    %55 = vector.extract_strided_slice %31 {offsets = [0, 0, 16], sizes = [4, 8, 16], strides = [1, 1, 1]} : vector<4x8x96xf32> to vector<4x8x16xf32>
    %56 = vector.extract_strided_slice %31 {offsets = [0, 0, 48], sizes = [4, 8, 16], strides = [1, 1, 1]} : vector<4x8x96xf32> to vector<4x8x16xf32>
    %57 = vector.extract_strided_slice %31 {offsets = [0, 0, 80], sizes = [4, 8, 16], strides = [1, 1, 1]} : vector<4x8x96xf32> to vector<4x8x16xf32>
    "tpu.trace_start"() <{level = 10 : i32, message = "bqd,bkd->bqk"}> : () -> ()
    %cst_26 = arith.constant dense<0.000000e+00> : vector<4x8x8xf32>
    %58 = tpu.matmul %55, %56, %cst_26 {dimension_numbers = #tpu.dot_dimension_numbers<[2], [2], [1], [1], [0, 0, 0, 1, 1, 1], [0], [0]>} : vector<4x8x16xf32>, vector<4x8x16xf32>, vector<4x8x8xf32> -> vector<4x8x8xf32>
    "tpu.trace_stop"() : () -> ()
    %cst_27 = arith.constant 2.500000e-01 : f32
    %59 = vector.broadcast %cst_27 : f32 to vector<4x8x8xf32>
    %60 = arith.mulf %58, %59 : vector<4x8x8xf32>
    %61 = arith.addf %60, %32 : vector<4x8x8xf32>
    %cst_28 = arith.constant dense<0xFF800000> : vector<4x8xf32>
    %62 = vector.multi_reduction <maximumf>, %61, %cst_28 [2] : vector<4x8x8xf32> to vector<4x8xf32>
    %63 = vector.shape_cast %62 : vector<4x8xf32> to vector<4x8x1xf32>
    %64 = vector.broadcast %63 : vector<4x8x1xf32> to vector<4x8x8xf32>
    %65 = arith.subf %61, %64 : vector<4x8x8xf32>
    %66 = math.exp %65 : vector<4x8x8xf32>
    %cst_29 = arith.constant dense<0.000000e+00> : vector<4x8xf32>
    %67 = vector.multi_reduction <add>, %66, %cst_29 [2] : vector<4x8x8xf32> to vector<4x8xf32>
    %68 = vector.shape_cast %67 : vector<4x8xf32> to vector<4x8x1xf32>
    %69 = tpu.reciprocal %68 {approx = true} : vector<4x8x1xf32> -> vector<4x8x1xf32>
    %70 = vector.broadcast %69 : vector<4x8x1xf32> to vector<4x8x8xf32>
    %71 = arith.mulf %66, %70 : vector<4x8x8xf32>
    "tpu.trace_start"() <{level = 10 : i32, message = "bqk,bkd->bqd"}> : () -> ()
    %cst_30 = arith.constant dense<0.000000e+00> : vector<4x8x16xf32>
    %72 = tpu.matmul %71, %57, %cst_30 {dimension_numbers = #tpu.dot_dimension_numbers<[2], [1], [1], [2], [0, 0, 0, 1, 1, 2], [0], [0]>} : vector<4x8x8xf32>, vector<4x8x16xf32>, vector<4x8x16xf32> -> vector<4x8x16xf32>
    "tpu.trace_stop"() : () -> ()
    %73 = vector.shape_cast %72 : vector<4x8x16xf32> to vector<32x16xf32>
    %74 = vector.extract_strided_slice %33 {offsets = [16, 0], sizes = [16, 32], strides = [1, 1]} : vector<32x32xf32> to vector<16x32xf32>
    %cst_31 = arith.constant dense<0.000000e+00> : vector<32x32xf32>
    %75 = tpu.matmul %73, %74, %cst_31 {dimension_numbers = #tpu.dot_dimension_numbers<[1], [0], [0], [1], [0, 0, 1, 1], [], []>} : vector<32x16xf32>, vector<16x32xf32>, vector<32x32xf32> -> vector<32x32xf32>
    %76 = arith.addf %54, %75 : vector<32x32xf32>
    %77 = arith.addf %1, %76 : vector<32x32xf32>
    %c0_32 = arith.constant 0 : index
    %c0_33 = arith.constant 0 : index
    %78 = vector.load %arg7[%c0_32, %c0_33] : memref<1x32xf32, #tpu.memory_space<vmem>>, vector<1x32xf32>
    %79 = vector.broadcast %78 : vector<1x32xf32> to vector<32x32xf32>
    %80 = arith.addf %77, %79 : vector<32x32xf32>
    %c0_34 = arith.constant 0 : index
    %c0_35 = arith.constant 0 : index
    %81 = vector.load %arg8[%c0_34, %c0_35] : memref<1x32xf32, #tpu.memory_space<vmem>>, vector<1x32xf32>
    %c0_36 = arith.constant 0 : index
    %c0_37 = arith.constant 0 : index
    %82 = vector.load %arg9[%c0_36, %c0_37] : memref<1x32xf32, #tpu.memory_space<vmem>>, vector<1x32xf32>
    %cst_38 = arith.constant dense<0.000000e+00> : vector<32xf32>
    %83 = vector.multi_reduction <add>, %80, %cst_38 [1] : vector<32x32xf32> to vector<32xf32>
    %84 = vector.shape_cast %83 : vector<32xf32> to vector<32x1xf32>
    %cst_39 = arith.constant 3.200000e+01 : f32
    %85 = vector.broadcast %cst_39 : f32 to vector<32x1xf32>
    %86 = arith.divf %84, %85 : vector<32x1xf32>
    %87 = vector.broadcast %86 : vector<32x1xf32> to vector<32x32xf32>
    %88 = arith.subf %80, %87 : vector<32x32xf32>
    %89 = arith.mulf %88, %88 : vector<32x32xf32>
    %cst_40 = arith.constant dense<0.000000e+00> : vector<32xf32>
    %90 = vector.multi_reduction <add>, %89, %cst_40 [1] : vector<32x32xf32> to vector<32xf32>
    %91 = vector.shape_cast %90 : vector<32xf32> to vector<32x1xf32>
    %cst_41 = arith.constant 3.200000e+01 : f32
    %92 = vector.broadcast %cst_41 : f32 to vector<32x1xf32>
    %93 = arith.divf %91, %92 : vector<32x1xf32>
    %94 = vector.broadcast %86 : vector<32x1xf32> to vector<32x32xf32>
    %95 = arith.subf %80, %94 : vector<32x32xf32>
    %cst_42 = arith.constant 9.99999974E-6 : f32
    %96 = vector.broadcast %cst_42 : f32 to vector<32x1xf32>
    %97 = arith.addf %93, %96 : vector<32x1xf32>
    %98 = math.rsqrt %97 : vector<32x1xf32>
    %99 = vector.broadcast %98 : vector<32x1xf32> to vector<32x32xf32>
    %100 = arith.mulf %95, %99 : vector<32x32xf32>
    %101 = vector.broadcast %81 : vector<1x32xf32> to vector<32x32xf32>
    %102 = arith.mulf %100, %101 : vector<32x32xf32>
    %103 = vector.broadcast %82 : vector<1x32xf32> to vector<32x32xf32>
    %104 = arith.addf %102, %103 : vector<32x32xf32>
    %c0_43 = arith.constant 0 : index
    %c0_44 = arith.constant 0 : index
    %105 = vector.load %arg10[%c0_43, %c0_44] : memref<32x128xf32, #tpu.memory_space<vmem>>, vector<32x128xf32>
    %cst_45 = arith.constant dense<0.000000e+00> : vector<32x128xf32>
    %106 = tpu.matmul %104, %105, %cst_45 {dimension_numbers = #tpu.dot_dimension_numbers<[1], [0], [0], [1], [0, 0, 1, 1], [], []>} : vector<32x32xf32>, vector<32x128xf32>, vector<32x128xf32> -> vector<32x128xf32>
    %c0_46 = arith.constant 0 : index
    %c0_47 = arith.constant 0 : index
    %107 = vector.load %arg11[%c0_46, %c0_47] : memref<1x128xf32, #tpu.memory_space<vmem>>, vector<1x128xf32>
    %108 = vector.broadcast %107 : vector<1x128xf32> to vector<32x128xf32>
    %109 = arith.addf %106, %108 : vector<32x128xf32>
    %cst_48 = arith.constant 5.000000e-01 : f32
    %110 = vector.broadcast %cst_48 : f32 to vector<32x128xf32>
    %111 = arith.mulf %110, %109 : vector<32x128xf32>
    %cst_49 = arith.constant 4.471500e-02 : f32
    %112 = vector.broadcast %cst_49 : f32 to vector<32x128xf32>
    %113 = arith.mulf %112, %109 : vector<32x128xf32>
    %114 = arith.mulf %113, %109 : vector<32x128xf32>
    %115 = arith.mulf %114, %109 : vector<32x128xf32>
    %116 = arith.addf %109, %115 : vector<32x128xf32>
    %cst_50 = arith.constant 0.797884583 : f32
    %117 = vector.broadcast %cst_50 : f32 to vector<32x128xf32>
    %118 = arith.mulf %117, %116 : vector<32x128xf32>
    %119 = math.tanh %118 : vector<32x128xf32>
    %cst_51 = arith.constant 1.000000e+00 : f32
    %120 = vector.broadcast %cst_51 : f32 to vector<32x128xf32>
    %121 = arith.addf %120, %119 : vector<32x128xf32>
    %122 = arith.mulf %111, %121 : vector<32x128xf32>
    %c0_52 = arith.constant 0 : index
    %c0_53 = arith.constant 0 : index
    %123 = vector.load %arg12[%c0_52, %c0_53] : memref<128x32xf32, #tpu.memory_space<vmem>>, vector<128x32xf32>
    %cst_54 = arith.constant dense<0.000000e+00> : vector<32x32xf32>
    %124 = tpu.matmul %122, %123, %cst_54 {dimension_numbers = #tpu.dot_dimension_numbers<[1], [0], [0], [1], [0, 0, 1, 1], [], []>} : vector<32x128xf32>, vector<128x32xf32>, vector<32x32xf32> -> vector<32x32xf32>
    %c0_55 = arith.constant 0 : index
    %c0_56 = arith.constant 0 : index
    %125 = vector.load %arg13[%c0_55, %c0_56] : memref<1x32xf32, #tpu.memory_space<vmem>>, vector<1x32xf32>
    %126 = vector.broadcast %125 : vector<1x32xf32> to vector<32x32xf32>
    %127 = arith.addf %124, %126 : vector<32x32xf32>
    %128 = arith.addf %80, %127 : vector<32x32xf32>
    %129 = vector.shape_cast %128 : vector<32x32xf32> to vector<4x8x32xf32>
    %c0_57 = arith.constant 0 : index
    %c0_58 = arith.constant 0 : index
    %c0_59 = arith.constant 0 : index
    %130 = vector.load %arg14[%c0_57, %c0_58, %c0_59] : memref<4x8x32xf32, #tpu.memory_space<vmem>>, vector<4x8x32xf32>
    tpu.vector_store %arg14[%c0_57, %c0_58, %c0_59], %129 {strides = array<i32>} : memref<4x8x32xf32, #tpu.memory_space<vmem>>, vector<4x8x32xf32>,
    return
  }
}

module attributes {stable_mosaic.version = 11 : i64} {
  func.func @_cls_kernel(%arg0: memref<2x32xf32, #tpu.memory_space<vmem>>, %arg1: memref<2x32xf32, #tpu.memory_space<vmem>>, %arg2: memref<1x32xf32, #tpu.memory_space<vmem>>, %arg3: memref<1x32xf32, #tpu.memory_space<vmem>>, %arg4: memref<1x64xf32, #tpu.memory_space<vmem>>, %arg5: memref<1x1xf32, #tpu.memory_space<vmem>>, %arg6: memref<2x1xf32, #tpu.memory_space<vmem>>) attributes {dimension_semantics = [], scalar_prefetch = 0 : i64, scratch_operands = 0 : i64, tpu.core_type = #tpu.core_type<tc>} {
    %c0 = arith.constant 0 : index
    %c0_0 = arith.constant 0 : index
    %0 = vector.load %arg0[%c0, %c0_0] : memref<2x32xf32, #tpu.memory_space<vmem>>, vector<2x32xf32>
    %c0_1 = arith.constant 0 : index
    %c0_2 = arith.constant 0 : index
    %1 = vector.load %arg2[%c0_1, %c0_2] : memref<1x32xf32, #tpu.memory_space<vmem>>, vector<1x32xf32>
    %c0_3 = arith.constant 0 : index
    %c0_4 = arith.constant 0 : index
    %2 = vector.load %arg3[%c0_3, %c0_4] : memref<1x32xf32, #tpu.memory_space<vmem>>, vector<1x32xf32>
    %cst = arith.constant dense<0.000000e+00> : vector<2xf32>
    %3 = vector.multi_reduction <add>, %0, %cst [1] : vector<2x32xf32> to vector<2xf32>
    %4 = vector.shape_cast %3 : vector<2xf32> to vector<2x1xf32>
    %cst_5 = arith.constant 3.200000e+01 : f32
    %5 = vector.broadcast %cst_5 : f32 to vector<2x1xf32>
    %6 = arith.divf %4, %5 : vector<2x1xf32>
    %7 = vector.broadcast %6 : vector<2x1xf32> to vector<2x32xf32>
    %8 = arith.subf %0, %7 : vector<2x32xf32>
    %9 = arith.mulf %8, %8 : vector<2x32xf32>
    %cst_6 = arith.constant dense<0.000000e+00> : vector<2xf32>
    %10 = vector.multi_reduction <add>, %9, %cst_6 [1] : vector<2x32xf32> to vector<2xf32>
    %11 = vector.shape_cast %10 : vector<2xf32> to vector<2x1xf32>
    %cst_7 = arith.constant 3.200000e+01 : f32
    %12 = vector.broadcast %cst_7 : f32 to vector<2x1xf32>
    %13 = arith.divf %11, %12 : vector<2x1xf32>
    %14 = vector.broadcast %6 : vector<2x1xf32> to vector<2x32xf32>
    %15 = arith.subf %0, %14 : vector<2x32xf32>
    %cst_8 = arith.constant 9.99999974E-6 : f32
    %16 = vector.broadcast %cst_8 : f32 to vector<2x1xf32>
    %17 = arith.addf %13, %16 : vector<2x1xf32>
    %18 = math.rsqrt %17 : vector<2x1xf32>
    %19 = vector.broadcast %18 : vector<2x1xf32> to vector<2x32xf32>
    %20 = arith.mulf %15, %19 : vector<2x32xf32>
    %21 = vector.broadcast %1 : vector<1x32xf32> to vector<2x32xf32>
    %22 = arith.mulf %20, %21 : vector<2x32xf32>
    %23 = vector.broadcast %2 : vector<1x32xf32> to vector<2x32xf32>
    %24 = arith.addf %22, %23 : vector<2x32xf32>
    %c0_9 = arith.constant 0 : index
    %c0_10 = arith.constant 0 : index
    %25 = vector.load %arg1[%c0_9, %c0_10] : memref<2x32xf32, #tpu.memory_space<vmem>>, vector<2x32xf32>
    %c0_11 = arith.constant 0 : index
    %c0_12 = arith.constant 0 : index
    %26 = vector.load %arg2[%c0_11, %c0_12] : memref<1x32xf32, #tpu.memory_space<vmem>>, vector<1x32xf32>
    %c0_13 = arith.constant 0 : index
    %c0_14 = arith.constant 0 : index
    %27 = vector.load %arg3[%c0_13, %c0_14] : memref<1x32xf32, #tpu.memory_space<vmem>>, vector<1x32xf32>
    %cst_15 = arith.constant dense<0.000000e+00> : vector<2xf32>
    %28 = vector.multi_reduction <add>, %25, %cst_15 [1] : vector<2x32xf32> to vector<2xf32>
    %29 = vector.shape_cast %28 : vector<2xf32> to vector<2x1xf32>
    %cst_16 = arith.constant 3.200000e+01 : f32
    %30 = vector.broadcast %cst_16 : f32 to vector<2x1xf32>
    %31 = arith.divf %29, %30 : vector<2x1xf32>
    %32 = vector.broadcast %31 : vector<2x1xf32> to vector<2x32xf32>
    %33 = arith.subf %25, %32 : vector<2x32xf32>
    %34 = arith.mulf %33, %33 : vector<2x32xf32>
    %cst_17 = arith.constant dense<0.000000e+00> : vector<2xf32>
    %35 = vector.multi_reduction <add>, %34, %cst_17 [1] : vector<2x32xf32> to vector<2xf32>
    %36 = vector.shape_cast %35 : vector<2xf32> to vector<2x1xf32>
    %cst_18 = arith.constant 3.200000e+01 : f32
    %37 = vector.broadcast %cst_18 : f32 to vector<2x1xf32>
    %38 = arith.divf %36, %37 : vector<2x1xf32>
    %39 = vector.broadcast %31 : vector<2x1xf32> to vector<2x32xf32>
    %40 = arith.subf %25, %39 : vector<2x32xf32>
    %cst_19 = arith.constant 9.99999974E-6 : f32
    %41 = vector.broadcast %cst_19 : f32 to vector<2x1xf32>
    %42 = arith.addf %38, %41 : vector<2x1xf32>
    %43 = math.rsqrt %42 : vector<2x1xf32>
    %44 = vector.broadcast %43 : vector<2x1xf32> to vector<2x32xf32>
    %45 = arith.mulf %40, %44 : vector<2x32xf32>
    %46 = vector.broadcast %26 : vector<1x32xf32> to vector<2x32xf32>
    %47 = arith.mulf %45, %46 : vector<2x32xf32>
    %48 = vector.broadcast %27 : vector<1x32xf32> to vector<2x32xf32>
    %49 = arith.addf %47, %48 : vector<2x32xf32>
    %c0_20 = arith.constant 0 : index
    %c0_21 = arith.constant 0 : index
    %50 = vector.load %arg4[%c0_20, %c0_21] : memref<1x64xf32, #tpu.memory_space<vmem>>, vector<1x64xf32>
    %51 = vector.extract_strided_slice %50 {offsets = [0, 0], sizes = [1, 32], strides = [1, 1]} : vector<1x64xf32> to vector<1x32xf32>
    %52 = vector.broadcast %51 : vector<1x32xf32> to vector<2x32xf32>
    %53 = arith.mulf %24, %52 : vector<2x32xf32>
    %54 = vector.extract_strided_slice %50 {offsets = [0, 32], sizes = [1, 32], strides = [1, 1]} : vector<1x64xf32> to vector<1x32xf32>
    %55 = vector.broadcast %54 : vector<1x32xf32> to vector<2x32xf32>
    %56 = arith.mulf %49, %55 : vector<2x32xf32>
    %57 = arith.addf %53, %56 : vector<2x32xf32>
    %cst_22 = arith.constant dense<0.000000e+00> : vector<2xf32>
    %58 = vector.multi_reduction <add>, %57, %cst_22 [1] : vector<2x32xf32> to vector<2xf32>
    %59 = vector.shape_cast %58 : vector<2xf32> to vector<2x1xf32>
    %c0_23 = arith.constant 0 : index
    %c0_24 = arith.constant 0 : index
    %60 = vector.load %arg5[%c0_23, %c0_24] : memref<1x1xf32, #tpu.memory_space<vmem>>, vector<1x1xf32>
    %61 = vector.broadcast %60 : vector<1x1xf32> to vector<2x1xf32>
    %62 = arith.addf %59, %61 : vector<2x1xf32>
    %c0_25 = arith.constant 0 : index
    %c0_26 = arith.constant 0 : index
    %63 = vector.load %arg6[%c0_25, %c0_26] : memref<2x1xf32, #tpu.memory_space<vmem>>, vector<2x1xf32>
    tpu.vector_store %arg6[%c0_25, %c0_26], %62 {strides = array<i32>} : memref<2x1xf32, #tpu.memory_space<vmem>>, vector<2x1xf32>,
    return
  }
}

</mosaic_0001>

<bundles_post_ra>
// kernel: headtail_forward.5
= control target key start
LH: loop header
LB: loop body
LE: loop exit
PB: predicated region body
PF: predicated region fallthrough
CT: control target
= control target key end

     0   :  { %vm28_vm0 = vcmask 254976   ;;  %s112_s27 = smov 96   ;;  %vm97_vm1 = vcmask 1024   ;;  %s174_s0 = inlined_call_operand.vmem [shape: f32[2,32], index: 0, kind: input, shape index: {}]   ;;  %s175_s1 = inlined_call_operand.vmem [shape: f32[2,32], index: 1, kind: input, shape index: {}]   ;;  %s176_s4 = inlined_call_operand.vmem [shape: f32[1,64], index: 4, kind: input, shape index: {}]   ;;  %s177_s5 = inlined_call_operand.<no memory space> [shape: f32[1,1], index: 5, kind: input, shape index: {}]   ;;  %s178_s2 = inlined_call_operand.vmem [shape: f32[1,32], index: 2, kind: input, shape index: {}]   ;;  %s179_s3 = inlined_call_operand.vmem [shape: f32[1,32], index: 3, kind: input, shape index: {}]   ;;  %s180_s6 = inlined_call_operand.vmem [shape: f32[2,1], index: 6, kind: output, shape index: {}]  }
   0x1   :  { %v25_v0 = vld [vmem:[%s174_s0] sm:$0x3]  ;;  %v11_v15 = vstv %s177_s5 }
   0x2   :  { %v57_v1 = vld [vmem:[%s175_s1] sm:$0x3]  ;;  %v29_v2 = vsel %vm28_vm0, %v25_v0, 0.0  ;;  %12 = vst [vmem:[#allocation2] sm:$0x1] %v11_v15 }
   0x3   :  { %30 = vadd.xlane.f32.xlu0 %v29_v2  ;;  %v58_v3 = vsel %vm28_vm0, %v57_v1, 0.0  ;;  %v105_v4 = vld [vmem:[%s176_s4] ss:$0 sm:$0xff] }
   0x4   :  { %v103_v23 = vld [vmem:[%s178_s2] ss:$0 sm:$0xff] }
   0x5   :  { %v104_v27 = vld [vmem:[%s179_s3] ss:$0 sm:$0xff] }
   0x7   :  { %59 = vadd.xlane.f32.xlu0 %v58_v3 }
   0x9   :  { %v106_v37 = vld [vmem:[#allocation2] ss:$0 sm:$0xff] }
  0x1d   :  { %81 = vrot.lane.b32.xlu0 %v105_v4, %s112_s27 }
  0x90   :  { %v31_v5 = vpop.xlane.xlu0 %30 }
  0x91   :  { %v33_v6 = vmul.f32 0.03125, %v31_v5 }
  0x93   :  { %v34_v7 = vsub.f32 %v25_v0, %v33_v6 }
  0x94   :  { %v60_v8 = vpop.xlane.xlu0 %59 }
  0x95   :  { %v61_v9 = vmul.f32 0.03125, %v60_v8  ;;  %v35_v10 = vmul.f32 %v34_v7, %v34_v7 }
  0x97   :  { %v62_v11 = vsub.f32 %v57_v1, %v61_v9  ;;  %v36_v12 = vsel %vm28_vm0, %v35_v10, 0.0 }
  0x98   :  { %37 = vadd.xlane.f32.xlu1 %v36_v12  ;;  %v82_v31 = vpop.permute.xlu0 %81 }
  0x99   :  { %v63_v13 = vmul.f32 %v62_v11, %v62_v11 }
  0x9b   :  { %v64_v14 = vsel %vm28_vm0, %v63_v13, 0.0 }
  0x9c   :  { %65 = vadd.xlane.f32.xlu1 %v64_v14 }
 0x125   :  { %v38_v16 = vpop.xlane.xlu1 %37 }
 0x126   :  { %v39_v17 = vmul.f32 0.03125, %v38_v16 }
 0x128   :  { %v40_v18 = vadd.f32 1e-05, %v39_v17 }
 0x129   :  { %v66_v19 = vpop.xlane.xlu1 %65 }
 0x12a   :  { %108 = vrsqrt.f32 %v40_v18  ;;  %v67_v20 = vmul.f32 0.03125, %v66_v19 }
 0x12c   :  { %v68_v21 = vadd.f32 1e-05, %v67_v20 }
 0x12e   :  { %110 = vrsqrt.f32 %v68_v21 }
 0x134   :  { %v109_v22 = vpop.eup %108 }
 0x135   :  { %v42_v24 = vmul.f32 %v109_v22, %v34_v7 }
 0x137   :  { %v49_v25 = vmul.f32 %v103_v23, %v42_v24 }
 0x138   :  { %v111_v26 = vpop.eup %110 }
 0x139   :  { %v70_v28 = vmul.f32 %v111_v26, %v62_v11  ;;  %v56_v29 = vadd.f32 %v104_v27, %v49_v25 }
 0x13b   :  { %v71_v30 = vmul.f32 %v103_v23, %v70_v28  ;;  %v80_v34 = vmul.f32 %v105_v4, %v56_v29 }
 0x13d   :  { %v72_v32 = vadd.f32 %v104_v27, %v71_v30 }
 0x13f   :  { %v84_v33 = vmul.f32 %v82_v31, %v72_v32 }
 0x141   :  { %v85_v35 = vadd.f32 %v84_v33, %v80_v34 }
 0x143   :  { %v86_v36 = vsel %vm28_vm0, %v85_v35, 0.0 }
 0x144   :  { %87 = vadd.xlane.f32.xlu1 %v86_v36 }
 0x1d1   :  { %v88_v38 = vpop.xlane.xlu1 %87 }
 0x1d2   :  { %v96_v39 = vadd.f32 %v106_v37, %v88_v38 }
 0x1d4   :  { %98 = vst.msk [vmem:[%s180_s6] sm:$0x3] %vm97_vm1, %v96_v39 }

// kernel: headtail_forward.3
= control target key start
LH: loop header
LB: loop body
LE: loop exit
PB: predicated region body
PF: predicated region fallthrough
CT: control target
= control target key end

     0   :  { %vm53_vm0 = vcmask 261120   ;;  %vm2542_vm1 = vmmov 0   ;;  %s2543_s15 = smov 96   ;;  %s2544_s16 = smov 64   ;;  %vm246_vm2 = vcmask 130048   ;;  %vm560_vm3 = vcmask 64512   ;;  %s2999_s0 = inlined_call_operand.vmem [shape: f32[4,8,32], index: 0, kind: input, shape index: {}]   ;;  %s3000_s4 = inlined_call_operand.vmem [shape: f32[32,96], index: 4, kind: input, shape index: {}]   ;;  %s3001_s2 = inlined_call_operand.vmem [shape: f32[1,32], index: 2, kind: input, shape index: {}]   ;;  %s3002_s3 = inlined_call_operand.vmem [shape: f32[1,32], index: 3, kind: input, shape index: {}]   ;;  %s3003_s5 = inlined_call_operand.vmem [shape: f32[1,96], index: 5, kind: input, shape index: {}]   ;;  %s3004_s1 = inlined_call_operand.vmem [shape: f32[4,8,8], index: 1, kind: input, shape index: {}]   ;;  %s3005_s6 = inlined_call_operand.vmem [shape: f32[32,32], index: 6, kind: input, shape index: {}]   ;;  %s3006_s7 = inlined_call_operand.vmem [shape: f32[1,32], index: 7, kind: input, shape index: {}]   ;;  %s3007_s10 = inlined_call_operand.vmem [shape: f32[32,128], index: 10, kind: input, shape index: {}]   ;;  %s3008_s12 = inlined_call_operand.vmem [shape: f32[128,32], index: 12, kind: input, shape index: {}]   ;;  %s3009_s8 = inlined_call_operand.vmem [shape: f32[1,32], index: 8, kind: input, shape index: {}]   ;;  %s3010_s9 = inlined_call_operand.vmem [shape: f32[1,32], index: 9, kind: input, shape index: {}]   ;;  %s3011_s11 = inlined_call_operand.vmem [shape: f32[1,128], index: 11, kind: input, shape index: {}]   ;;  %s3012_s13 = inlined_call_operand.vmem [shape: f32[1,32], index: 13, kind: input, shape index: {}]   ;;  %s3013_s14 = inlined_call_operand.vmem [shape: f32[4,8,32], index: 14, kind: output, shape index: {}]  }
   0x1   :  { %v2626_v0 = vld [vmem:[%s2999_s0] sm:$0xff]  ;;  %v2631_v1 = vld [vmem:[%s2999_s0 + $0x10] sm:$0xff]  ;;  %v2636_v2 = vld [vmem:[%s2999_s0 + $0x8] sm:$0xff]  ;;  %s2545_s23 = smov 80   ;;  %s2546_s24 = smov 112  }
   0x2   :  { %v54_v3 = vsel %vm53_vm0, %v2626_v0, 0.0  ;;  %v60_v4 = vsel %vm53_vm0, %v2631_v1, 0.0  ;;  %v2645_v5 = vld [vmem:[%s2999_s0 + $0x18] sm:$0xff]  ;;  %v57_v6 = vsel %vm53_vm0, %v2636_v2, 0.0  ;;  %v127_v28 = vld [vmem:[%s3000_s4] sm:$0xff]  ;;  %v128_v29 = vld [vmem:[%s3000_s4 + $0x8] sm:$0xff] }
   0x3   :  { %55 = vadd.xlane.f32.xlu0 %v54_v3  ;;  %61 = vadd.xlane.f32.xlu1 %v60_v4  ;;  %v63_v7 = vsel %vm53_vm0, %v2645_v5, 0.0  ;;  %v129_v30 = vld [vmem:[%s3000_s4 + $0x10] sm:$0xff]  ;;  %v2418_v31 = vpack.c.bf16 %v128_v29, %v127_v28  ;;  %v130_v32 = vld [vmem:[%s3000_s4 + $0x18] sm:$0xff]  ;;  %v2124_v47 = vld [vmem:[%s3001_s2] ss:$0 sm:$0xff]  ;;  %v2541_v3 = vmov 0.0  }
   0x4   :  { %v2422_v33 = vpack.c.bf16 %v130_v32, %v129_v30  ;;  %v2125_v49 = vld [vmem:[%s3002_s3] ss:$0 sm:$0xff]  ;;  %2291 = vmatprep.subr.mxu0 %v2541_v3  ;;  %2293 = vmatprep.mubr.msk.f32.mxu0 %vm2542_vm1, %v2541_v3  ;;  %v2748_v32 = vld [vmem:[%s3004_s1 + $0x10] sm:$0xff] }
   0x5   :  { %2419 = vmatprep.subr.bf16.mxu1 %v2418_v31  ;;  %v2126_v4 = vld [vmem:[%s3003_s5] ss:$0 sm:$0xff] }
   0x6   :  { %2421 = vmatpush3.bf16.msra.mxu1 %v2418_v31 }
   0x7   :  { %58 = vadd.xlane.f32.xlu0 %v57_v6  ;;  %64 = vadd.xlane.f32.xlu1 %v63_v7 }
   0x8   :  { %2423 = vmatprep.subr.bf16.mxu1 %v2422_v33 }
   0xa   :  { %2425 = vmatpush3.bf16.msra.mxu1 %v2422_v33 }
   0xb   :  { %2266 = vmatprep.subr.mxu1 %v2541_v3 }
  0x90   :  { %v56_v8 = vpop.xlane.xlu0 %55  ;;  %v62_v9 = vpop.xlane.xlu1 %61 }
  0x91   :  { %v67_v10 = vmul.f32 0.03125, %v56_v8  ;;  %v69_v11 = vmul.f32 0.03125, %v62_v9 }
  0x93   :  { %v71_v12 = vsub.f32 %v2626_v0, %v67_v10  ;;  %v73_v13 = vsub.f32 %v2631_v1, %v69_v11 }
  0x94   :  { %v59_v14 = vpop.xlane.xlu0 %58  ;;  %v65_v15 = vpop.xlane.xlu1 %64 }
  0x95   :  { %v68_v16 = vmul.f32 0.03125, %v59_v14  ;;  %v70_v17 = vmul.f32 0.03125, %v65_v15  ;;  %v75_v18 = vmul.f32 %v71_v12, %v71_v12  ;;  %v77_v19 = vmul.f32 %v73_v13, %v73_v13 }
  0x97   :  { %v72_v20 = vsub.f32 %v2636_v2, %v68_v16  ;;  %v74_v21 = vsub.f32 %v2645_v5, %v70_v17  ;;  %v79_v22 = vsel %vm53_vm0, %v75_v18, 0.0  ;;  %v85_v23 = vsel %vm53_vm0, %v77_v19, 0.0 }
  0x98   :  { %80 = vadd.xlane.f32.xlu0 %v79_v22 }
  0x99   :  { %v76_v24 = vmul.f32 %v72_v20, %v72_v20  ;;  %v78_v25 = vmul.f32 %v74_v21, %v74_v21 }
  0x9b   :  { %v82_v26 = vsel %vm53_vm0, %v76_v24, 0.0  ;;  %v88_v27 = vsel %vm53_vm0, %v78_v25, 0.0 }
  0x9c   :  { %86 = vadd.xlane.f32.xlu0 %v85_v23  ;;  %83 = vadd.xlane.f32.xlu1 %v82_v26  ;;  %v2741_v26 = vld [vmem:[%s3004_s1 + $0x8] sm:$0xff] }
  0xa0   :  { %89 = vadd.xlane.f32.xlu1 %v88_v27 }
 0x125   :  { %v81_v34 = vpop.xlane.xlu0 %80 }
 0x126   :  { %v91_v35 = vmul.f32 0.03125, %v81_v34 }
 0x128   :  { %v95_v36 = vadd.f32 1e-05, %v91_v35 }
 0x129   :  { %v84_v37 = vpop.xlane.xlu1 %83  ;;  %v87_v38 = vpop.xlane.xlu0 %86 }
 0x12a   :  { %2485 = vrsqrt.f32 %v95_v36  ;;  %v92_v39 = vmul.f32 0.03125, %v84_v37  ;;  %v93_v40 = vmul.f32 0.03125, %v87_v38  ;;  %v2755_v38 = vld [vmem:[%s3004_s1 + $0x18] sm:$0xff] }
 0x12c   :  { %v96_v41 = vadd.f32 1e-05, %v92_v39  ;;  %v97_v42 = vadd.f32 1e-05, %v93_v40 }
 0x12d   :  { %v90_v43 = vpop.xlane.xlu1 %89 }
 0x12e   :  { %2487 = vrsqrt.f32 %v96_v41  ;;  %v94_v44 = vmul.f32 0.03125, %v90_v43 }
 0x12f   :  { %2489 = vrsqrt.f32 %v97_v42 }
 0x130   :  { %v98_v45 = vadd.f32 1e-05, %v94_v44 }
 0x132   :  { %2491 = vrsqrt.f32 %v98_v45 }
 0x134   :  { %v2486_v46 = vpop.eup %2485 }
 0x135   :  { %v103_v48 = vmul.f32 %v2486_v46, %v71_v12 }
 0x137   :  { %v113_v50 = vmul.f32 %v2124_v47, %v103_v48 }
 0x138   :  { %v2488_v51 = vpop.eup %2487 }
 0x139   :  { %v2490_v52 = vpop.eup %2489  ;;  %v123_v53 = vadd.f32 %v2125_v49, %v113_v50  ;;  %v104_v54 = vmul.f32 %v2488_v51, %v72_v20 }
 0x13a   :  { %v105_v55 = vmul.f32 %v2490_v52, %v73_v13 }
 0x13b   :  { %2260 = vmatprep.mubr.msk.f32.mxu1 %vm53_vm0, %v123_v53  ;;  %v114_v56 = vmul.f32 %v2124_v47, %v104_v54 }
 0x13c   :  { %v2492_v57 = vpop.eup %2491  ;;  %v115_v58 = vmul.f32 %v2124_v47, %v105_v55 }
 0x13d   :  { %v124_v59 = vadd.f32 %v2125_v49, %v114_v56  ;;  %v106_v60 = vmul.f32 %v2492_v57, %v74_v21  ;;  %v2735_v21 = vld [vmem:[%s3004_s1] sm:$0xff]  ;;  %s2547_s1 = smov 48  }
 0x13e   :  { %v125_v61 = vadd.f32 %v2125_v49, %v115_v58 }
 0x13f   :  { %2261 = vmatmul.mubr.msk.f32.vlgmr.msra.gmra.mrb[0].mxu1 %vm53_vm0, %v124_v59  ;;  %v116_v62 = vmul.f32 %v2124_v47, %v106_v60 }
 0x140   :  { %2263 = vmatprep.mubr.msk.f32.mxu1 %vm53_vm0, %v125_v61 }
 0x141   :  { %v126_v63 = vadd.f32 %v2125_v49, %v116_v62 }
 0x143   :  { %2264 = vmatmul.mubr.msk.f32.gmra.mrb[2].mxu1 %vm53_vm0, %v126_v63 }
 0x144   :  { %2268 = vmatprep.mubr.msk.f32.mxu1 %vm2542_vm1, %v2541_v3 }
 0x212   :  { %v2262_v6 = vpop.f32.mrb[0].mxu1 }
 0x213   :  { %v2690_v7 = vadd.f32 %v2262_v6, %v2126_v4  ;;  %v216_v8 = vpop.f32.mrb[1].mxu1 }
 0x214   :  { %v2692_v9 = vadd.f32 %v2126_v4, %v216_v8 }
 0x215   :  { %322 = vrot.lane.b32.xlu1 %v2690_v7, %s2543_s15 }
 0x216   :  { %244 = vrot.lane.b32.xlu0 %v2692_v9, %s2543_s15  ;;  %v2265_v10 = vpop.f32.mrb[2].mxu1 }
 0x217   :  { %v226_v11 = vpop.f32.mrb[3].mxu1  ;;  %v2700_v13 = vadd.f32 %v2265_v10, %v2126_v4 }
 0x218   :  { %v2696_v12 = vadd.f32 %v2126_v4, %v226_v11 }
 0x21a   :  { %605 = vrot.lane.b32.xlu0 %v2692_v9, %s2544_s16  ;;  %399 = vrot.lane.b32.xlu1 %v2696_v12, %s2543_s15 }
 0x21e   :  { %476 = vrot.lane.b32.xlu1 %v2700_v13, %s2543_s15 }
 0x222   :  { %681 = vrot.lane.b32.xlu1 %v2690_v7, %s2544_s16 }
 0x226   :  { %833 = vrot.lane.b32.xlu1 %v2700_v13, %s2544_s16 }
 0x22a   :  { %757 = vrot.lane.b32.xlu1 %v2696_v12, %s2544_s16 }
 0x287   :  { %v323_v14 = vpop.permute.xlu1 %322 }
 0x288   :  { %v245_v15 = vpop.permute.xlu0 %244 }
 0x289   :  { %2267 = vmatpush3.xpose.msk.msra.mxu1 %vm246_vm2, %v245_v15 }
 0x28a   :  { %2271 = vmatprep.subr.mxu1 %v2541_v3 }
 0x28c   :  { %v400_v16 = vpop.permute.xlu1 %399  ;;  %2269 = vmatmul.mubr.msk.f32.vlgmr.msra.gmra.mrb[4].mxu1 %vm246_vm2, %v2692_v9  ;;  %v606_v19 = vpop.permute.xlu0 %605 }
 0x28d   :  { %2272 = vmatpush3.xpose.msk.msra.mxu1 %vm246_vm2, %v323_v14  ;;  %2273 = vmatprep.mubr.msk.f32.mxu1 %vm2542_vm1, %v2541_v3 }
 0x28e   :  { %2276 = vmatprep.subr.mxu1 %v2541_v3 }
 0x290   :  { %v477_v17 = vpop.permute.xlu1 %476  ;;  %2274 = vmatmul.mubr.msk.f32.vlgmr.msra.gmra.mrb[6].mxu1 %vm246_vm2, %v2690_v7 }
 0x291   :  { %2277 = vmatpush3.xpose.msk.msra.mxu1 %vm246_vm2, %v400_v16  ;;  %2278 = vmatprep.mubr.msk.f32.mxu1 %vm2542_vm1, %v2541_v3 }
 0x292   :  { %2281 = vmatprep.subr.mxu1 %v2541_v3 }
 0x294   :  { %v682_v18 = vpop.permute.xlu1 %681  ;;  %2279 = vmatmul.mubr.msk.f32.vlgmr.msra.gmra.mrb[8].mxu1 %vm246_vm2, %v2696_v12 }
 0x295   :  { %2282 = vmatpush3.xpose.msk.msra.mxu1 %vm246_vm2, %v477_v17  ;;  %2292 = vmatpush3.msra.mxu0 %v682_v18 }
 0x296   :  { %2283 = vmatprep.mubr.msk.f32.mxu1 %vm2542_vm1, %v2541_v3  ;;  %2286 = vmatprep.subr.mxu1 %v2541_v3 }
 0x297   :  { %2301 = vmatprep.subr.mxu0 %v2541_v3 }
 0x298   :  { %2284 = vmatmul.mubr.msk.f32.vlgmr.msra.gmra.mrb[10].mxu1 %vm246_vm2, %v2700_v13  ;;  %v834_v44 = vpop.permute.xlu1 %833 }
 0x299   :  { %2287 = vmatpush3.msra.mxu1 %v606_v19  ;;  %2288 = vmatprep.mubr.msk.f32.mxu1 %vm2542_vm1, %v2541_v3 }
 0x29a   :  { %2296 = vmatprep.subr.mxu1 %v2541_v3 }
 0x29c   :  { %v758_v45 = vpop.permute.xlu1 %757 }
 0x35f   :  { %v317_v20 = vpop.f32.mrb[4].mxu1 }
 0x360   :  { %v552_v22 = vmul.f32 0.25, %v317_v20  ;;  %v2270_v23 = vpop.f32.mrb[5].mxu1 }
 0x362   :  { %v556_v24 = vadd.f32 %v552_v22, %v2735_v21 }
 0x363   :  { %v394_v25 = vpop.f32.mrb[6].mxu1 }
 0x364   :  { %v553_v27 = vmul.f32 0.25, %v394_v25  ;;  %v2275_v28 = vpop.f32.mrb[7].mxu1  ;;  %v561_v29 = vsel %vm560_vm3, %v556_v24, -inf }
 0x365   :  { %562 = vmax.xlane.f32.xlu0 %v561_v29 }
 0x366   :  { %v557_v30 = vadd.f32 %v553_v27, %v2741_v26 }
 0x367   :  { %v471_v31 = vpop.f32.mrb[8].mxu1 }
 0x368   :  { %v554_v33 = vmul.f32 0.25, %v471_v31  ;;  %v2280_v34 = vpop.f32.mrb[9].mxu1  ;;  %v564_v35 = vsel %vm560_vm3, %v557_v30, -inf }
 0x369   :  { %565 = vmax.xlane.f32.xlu1 %v564_v35 }
 0x36a   :  { %v558_v36 = vadd.f32 %v554_v33, %v2748_v32 }
 0x36b   :  { %v548_v37 = vpop.f32.mrb[10].mxu1 }
 0x36c   :  { %v555_v39 = vmul.f32 0.25, %v548_v37  ;;  %v2285_v40 = vpop.f32.mrb[11].mxu1  ;;  %v567_v41 = vsel %vm560_vm3, %v558_v36, -inf }
 0x36d   :  { %568 = vmax.xlane.f32.xlu0 %v567_v41 }
 0x36e   :  { %v559_v42 = vadd.f32 %v555_v39, %v2755_v38 }
 0x370   :  { %v570_v43 = vsel %vm560_vm3, %v559_v42, -inf }
 0x371   :  { %571 = vmax.xlane.f32.xlu0 %v570_v43 }
 0x37a   :  { %989 = vrot.lane.b32.xlu1 %v2690_v7, %s2545_s23 }
 0x37e   :  { %987 = vrot.lane.b32.xlu1 %v2690_v7, %s2546_s24 }
 0x387   :  { %911 = vrot.lane.b32.xlu0 %v2692_v9, %s2545_s23 }
 0x3f2   :  { %v563_v46 = vpop.xlane.xlu0 %562 }
 0x3f3   :  { %v573_v47 = vsub.f32 %v556_v24, %v563_v46 }
 0x3f5   :  { %v577_v48 = vmul.f32 1.442695, %v573_v47 }
 0x3f6   :  { %v566_v49 = vpop.xlane.xlu1 %565 }
 0x3f7   :  { %2493 = vpow2.f32 %v577_v48  ;;  %v574_v50 = vsub.f32 %v557_v30, %v566_v49 }
 0x3f9   :  { %v579_v51 = vmul.f32 1.442695, %v574_v50 }
 0x3fa   :  { %v569_v56 = vpop.xlane.xlu0 %568  ;;  %v990_v8 = vpop.permute.xlu1 %989 }
 0x3fb   :  { %2495 = vpow2.f32 %v579_v51  ;;  %v575_v57 = vsub.f32 %v558_v36, %v569_v56 }
 0x3fd   :  { %v581_v59 = vmul.f32 1.442695, %v575_v57 }
 0x3fe   :  { %v572_v58 = vpop.xlane.xlu0 %571  ;;  %v988_v11 = vpop.permute.xlu1 %987 }
 0x3ff   :  { %v576_v60 = vsub.f32 %v559_v42, %v572_v58  ;;  %2497 = vpow2.f32 %v581_v59 }
 0x401   :  { %v2494_v52 = vpop.eup %2493  ;;  %v583_v61 = vmul.f32 1.442695, %v576_v60 }
 0x402   :  { %v585_v53 = vsel %vm560_vm3, %v2494_v52, 0.0  ;;  %v912_v10 = vpop.permute.xlu0 %911 }
 0x403   :  { %586 = vadd.xlane.f32.xlu0 %v585_v53  ;;  %2499 = vpow2.f32 %v583_v61 }
 0x405   :  { %v2496_v54 = vpop.eup %2495 }
 0x406   :  { %v588_v55 = vsel %vm560_vm3, %v2496_v54, 0.0 }
 0x407   :  { %589 = vadd.xlane.f32.xlu1 %v588_v55 }
 0x409   :  { %v2498_v62 = vpop.eup %2497 }
 0x40a   :  { %v591_v63 = vsel %vm560_vm3, %v2498_v62, 0.0 }
 0x40d   :  { %v2500_v4 = vpop.eup %2499 }
 0x40e   :  { %v594_v6 = vsel %vm560_vm3, %v2500_v4, 0.0 }
 0x418   :  { %1145 = vrot.lane.b32.xlu1 %v2700_v13, %s2545_s23 }
 0x419   :  { %909 = vrot.lane.b32.xlu0 %v2692_v9, %s2546_s24 }
 0x438   :  { %592 = vadd.xlane.f32.xlu0 %v591_v63 }
 0x43c   :  { %595 = vadd.xlane.f32.xlu1 %v594_v6 }
 0x44d   :  { %1143 = vrot.lane.b32.xlu1 %v2700_v13, %s2546_s24 }
 0x44e   :  { %1067 = vrot.lane.b32.xlu0 %v2696_v12, %s2545_s23 }
 0x452   :  { %1065 = vrot.lane.b32.xlu0 %v2696_v12, %s2546_s24 }
 0x490   :  { %v587_v14 = vpop.xlane.xlu0 %586 }
 0x491   :  { %2501 = vrcp.f32 %v587_v14 }
 0x494   :  { %v590_v15 = vpop.xlane.xlu1 %589  ;;  %v910_v20 = vpop.permute.xlu0 %909 }
 0x495   :  { %2503 = vrcp.f32 %v590_v15 }
 0x498   :  { %v1146_v22 = vpop.permute.xlu1 %1145 }
 0x49b   :  { %v2502_v16 = vpop.eup %2501 }
 0x49c   :  { %v601_v17 = vmul.f32 %v2502_v16, %v2494_v52 }
 0x49e   :  { %2289 = vmatmul.mubr.msk.f32.vlgmr.msra.gmra.mrb[12].mxu1 %vm560_vm3, %v601_v17 }
 0x49f   :  { %v2504_v18 = vpop.eup %2503  ;;  %2297 = vmatpush3.msra.mxu1 %v758_v45  ;;  %2298 = vmatprep.mubr.msk.f32.mxu1 %vm2542_vm1, %v2541_v3 }
 0x4a0   :  { %v602_v19 = vmul.f32 %v2504_v18, %v2496_v54  ;;  %2306 = vmatprep.subr.mxu1 %v2541_v3 }
 0x4a2   :  { %2294 = vmatmul.mubr.msk.f32.vlgmr.msra.gmra.mrb[0].mxu0 %vm560_vm3, %v602_v19 }
 0x4a3   :  { %2302 = vmatpush3.msra.mxu0 %v834_v44  ;;  %2303 = vmatprep.mubr.msk.f32.mxu0 %vm2542_vm1, %v2541_v3 }
 0x4a4   :  { %2311 = vmatprep.subr.mxu0 %v2541_v3 }
 0x4c5   :  { %v593_v23 = vpop.xlane.xlu0 %592 }
 0x4c6   :  { %2505 = vrcp.f32 %v593_v23 }
 0x4c9   :  { %v596_v24 = vpop.xlane.xlu1 %595  ;;  %v1068_v29 = vpop.permute.xlu0 %1067 }
 0x4ca   :  { %2507 = vrcp.f32 %v596_v24 }
 0x4cd   :  { %v1066_v31 = vpop.permute.xlu0 %1065  ;;  %v1144_v33 = vpop.permute.xlu1 %1143 }
 0x4d0   :  { %v2506_v25 = vpop.eup %2505 }
 0x4d1   :  { %v603_v27 = vmul.f32 %v2506_v25, %v2498_v62 }
 0x4d3   :  { %2299 = vmatmul.mubr.msk.f32.vlgmr.msra.gmra.mrb[14].mxu1 %vm560_vm3, %v603_v27 }
 0x4d4   :  { %v2508_v28 = vpop.eup %2507  ;;  %2307 = vmatpush3.xpose.msk.msra.mxu1 %vm246_vm2, %v912_v10  ;;  %2308 = vmatprep.mubr.msk.f32.mxu1 %vm2542_vm1, %v2541_v3 }
 0x4d5   :  { %v604_v30 = vmul.f32 %v2508_v28, %v2500_v4  ;;  %2316 = vmatprep.subr.mxu1 %v2541_v3 }
 0x4d7   :  { %2304 = vmatmul.mubr.msk.f32.vlgmr.msra.gmra.mrb[2].mxu0 %vm560_vm3, %v604_v30  ;;  %2309 = vmatmul.mubr.msk.f32.vlgmr.msra.gmra.mrb[16].mxu1 %vm246_vm2, %v910_v20 }
 0x4d8   :  { %2312 = vmatpush3.xpose.msk.msra.mxu0 %vm246_vm2, %v990_v8  ;;  %2317 = vmatpush3.xpose.msk.msra.mxu1 %vm246_vm2, %v1068_v29 }
 0x4d9   :  { %2313 = vmatprep.mubr.msk.f32.mxu0 %vm2542_vm1, %v2541_v3  ;;  %2318 = vmatprep.mubr.msk.f32.mxu1 %vm2542_vm1, %v2541_v3 }
 0x4da   :  { %2321 = vmatprep.subr.mxu0 %v2541_v3  ;;  %2326 = vmatprep.subr.mxu1 %v2541_v3 }
 0x4db   :  { %2314 = vmatmul.mubr.msk.f32.vlgmr.msra.gmra.mrb[4].mxu0 %vm246_vm2, %v988_v11  ;;  %2319 = vmatmul.mubr.msk.f32.vlgmr.msra.gmra.mrb[18].mxu1 %vm246_vm2, %v1066_v31 }
 0x4dc   :  { %2322 = vmatpush3.xpose.msk.msra.mxu0 %vm246_vm2, %v1146_v22  ;;  %2323 = vmatprep.mubr.msk.f32.mxu0 %vm2542_vm1, %v2541_v3 }
 0x4dd   :  { %2331 = vmatprep.subr.mxu0 %v2541_v3  ;;  %2328 = vmatprep.mubr.msk.f32.mxu1 %vm2542_vm1, %v2541_v3 }
 0x4df   :  { %2324 = vmatmul.mubr.msk.f32.vlgmr.msra.gmra.mrb[6].mxu0 %vm246_vm2, %v1144_v33 }
 0x4e0   :  { %2333 = vmatprep.mubr.msk.f32.mxu0 %vm2542_vm1, %v2541_v3 }
 0x571   :  { %v2814_v34 = vpop.f32.mrb[12].mxu1 }
 0x572   :  { %v2290_v35 = vpop.f32.mrb[13].mxu1 }
 0x575   :  { %v2816_v36 = vpop.f32.mrb[0].mxu0 }
 0x576   :  { %v2295_v37 = vpop.f32.mrb[1].mxu0 }
 0x5a6   :  { %v2818_v39 = vpop.f32.mrb[14].mxu1 }
 0x5a7   :  { %v2300_v40 = vpop.f32.mrb[15].mxu1 }
 0x5aa   :  { %v2820_v41 = vpop.f32.mrb[2].mxu0  ;;  %v983_v42 = vpop.f32.mrb[16].mxu1 }
 0x5ab   :  { %v1221_v43 = vmul.f32 0.25, %v983_v42  ;;  %v2305_v44 = vpop.f32.mrb[3].mxu0  ;;  %v2310_v45 = vpop.f32.mrb[17].mxu1 }
 0x5ac   :  { %v241_v44 = vld [vmem:[%s3005_s6 + $0x10] sm:$0xff]  ;;  %v242_v45 = vld [vmem:[%s3005_s6 + $0x18] sm:$0xff] }
 0x5ad   :  { %v1225_v46 = vadd.f32 %v1221_v43, %v2735_v21 }
 0x5ae   :  { %v1061_v47 = vpop.f32.mrb[4].mxu0  ;;  %v1139_v48 = vpop.f32.mrb[18].mxu1 }
 0x5af   :  { %v1222_v49 = vmul.f32 0.25, %v1061_v47  ;;  %v1223_v50 = vmul.f32 0.25, %v1139_v48  ;;  %v2315_v51 = vpop.f32.mrb[5].mxu0  ;;  %v2320_v52 = vpop.f32.mrb[19].mxu1  ;;  %v1229_v53 = vsel %vm560_vm3, %v1225_v46, -inf  ;;  %v240_v47 = vld [vmem:[%s3005_s6 + $0x8] sm:$0xff] }
 0x5b0   :  { %1230 = vmax.xlane.f32.xlu0 %v1229_v53 }
 0x5b1   :  { %v1226_v54 = vadd.f32 %v1222_v49, %v2741_v26  ;;  %v1227_v55 = vadd.f32 %v1223_v50, %v2748_v32 }
 0x5b2   :  { %v1217_v56 = vpop.f32.mrb[6].mxu0 }
 0x5b3   :  { %v1224_v57 = vmul.f32 0.25, %v1217_v56  ;;  %v2325_v58 = vpop.f32.mrb[7].mxu0  ;;  %v1232_v59 = vsel %vm560_vm3, %v1226_v54, -inf  ;;  %v1235_v21 = vsel %vm560_vm3, %v1227_v55, -inf }
 0x5b4   :  { %1233 = vmax.xlane.f32.xlu1 %v1232_v59  ;;  %1236 = vmax.xlane.f32.xlu0 %v1235_v21  ;;  %v2163_v58 = vld [vmem:[%s3006_s7] ss:$0 sm:$0xff] }
 0x5b5   :  { %v1228_v60 = vadd.f32 %v1224_v57, %v2755_v38 }
 0x5b7   :  { %v1238_v61 = vsel %vm560_vm3, %v1228_v60, -inf }
 0x5b8   :  { %1239 = vmax.xlane.f32.xlu0 %v1238_v61 }
 0x63d   :  { %v1231_v62 = vpop.xlane.xlu0 %1230 }
 0x63e   :  { %v1241_v63 = vsub.f32 %v1225_v46, %v1231_v62  ;;  %v2426_v46 = vpack.c.bf16 %v242_v45, %v241_v44 }
 0x640   :  { %v1245_v4 = vmul.f32 1.442695, %v1241_v63 }
 0x641   :  { %v1234_v26 = vpop.xlane.xlu1 %1233  ;;  %v1237_v6 = vpop.xlane.xlu0 %1236 }
 0x642   :  { %2509 = vpow2.f32 %v1245_v4  ;;  %v1242_v32 = vsub.f32 %v1226_v54, %v1234_v26  ;;  %v1243_v8 = vsub.f32 %v1227_v55, %v1237_v6 }
 0x644   :  { %v1247_v10 = vmul.f32 1.442695, %v1242_v32  ;;  %v1249_v11 = vmul.f32 1.442695, %v1243_v8 }
 0x645   :  { %v1240_v19 = vpop.xlane.xlu0 %1239 }
 0x646   :  { %2511 = vpow2.f32 %v1247_v10  ;;  %v1244_v20 = vsub.f32 %v1228_v60, %v1240_v19 }
 0x647   :  { %2513 = vpow2.f32 %v1249_v11 }
 0x648   :  { %v1251_v22 = vmul.f32 1.442695, %v1244_v20 }
 0x64a   :  { %2515 = vpow2.f32 %v1251_v22 }
 0x64c   :  { %v2510_v14 = vpop.eup %2509 }
 0x64d   :  { %v1253_v15 = vsel %vm560_vm3, %v2510_v14, 0.0 }
 0x64e   :  { %1254 = vadd.xlane.f32.xlu0 %v1253_v15 }
 0x650   :  { %v2512_v38 = vpop.eup %2511 }
 0x651   :  { %v2514_v16 = vpop.eup %2513  ;;  %v1256_v17 = vsel %vm560_vm3, %v2512_v38, 0.0 }
 0x652   :  { %1257 = vadd.xlane.f32.xlu1 %v1256_v17  ;;  %v1259_v18 = vsel %vm560_vm3, %v2514_v16, 0.0 }
 0x653   :  { %1260 = vadd.xlane.f32.xlu0 %v1259_v18 }
 0x654   :  { %v2516_v23 = vpop.eup %2515 }
 0x655   :  { %v1262_v24 = vsel %vm560_vm3, %v2516_v23, 0.0 }
 0x663   :  { %1349 = vrot.lane.b32.xlu1 %v2690_v7, %s2547_s1 }
 0x667   :  { %1425 = vrot.lane.b32.xlu1 %v2696_v12, %s2547_s1 }
 0x669   :  { %1273 = vrot.lane.b32.xlu0 %v2692_v9, %s2547_s1 }
 0x68b   :  { %1263 = vadd.xlane.f32.xlu1 %v1262_v24 }
 0x69c   :  { %1501 = vrot.lane.b32.xlu1 %v2700_v13, %s2547_s1 }
 0x6db   :  { %v1255_v25 = vpop.xlane.xlu0 %1254 }
 0x6dc   :  { %2517 = vrcp.f32 %v1255_v25 }
 0x6df   :  { %v1258_v27 = vpop.xlane.xlu1 %1257 }
 0x6e0   :  { %2519 = vrcp.f32 %v1258_v27  ;;  %v1261_v28 = vpop.xlane.xlu0 %1260 }
 0x6e1   :  { %2521 = vrcp.f32 %v1261_v28 }
 0x6e3   :  { %v1350_v7 = vpop.permute.xlu1 %1349 }
 0x6e4   :  { %v1274_v12 = vpop.permute.xlu0 %1273  ;;  %2332 = vmatpush3.msra.mxu0 %v1350_v7  ;;  %v1860_v7 = vld [vmem:[%s3007_s10] sm:$0xff] }
 0x6e5   :  { %2327 = vmatpush3.msra.mxu1 %v1274_v12  ;;  %2341 = vmatprep.subr.mxu0 %v2541_v3  ;;  %v1861_v12 = vld [vmem:[%s3007_s10 + $0x8] sm:$0xff] }
 0x6e6   :  { %v2518_v9 = vpop.eup %2517  ;;  %2336 = vmatprep.subr.mxu1 %v2541_v3 }
 0x6e7   :  { %v1269_v29 = vmul.f32 %v2518_v9, %v2510_v14  ;;  %v1426_v30 = vpop.permute.xlu1 %1425  ;;  %v2434_v9 = vpack.c.bf16 %v1861_v12, %v1860_v7  ;;  %v2166_v7 = vld [vmem:[%s3011_s11] ss:$0 sm:$0xff] }
 0x6e9   :  { %2329 = vmatmul.mubr.msk.f32.vlgmr.msra.gmra.mrb[20].mxu1 %vm560_vm3, %v1269_v29  ;;  %v1862_v29 = vld [vmem:[%s3007_s10 + $0x10] sm:$0xff] }
 0x6ea   :  { %v2520_v13 = vpop.eup %2519  ;;  %2337 = vmatpush3.msra.mxu1 %v1426_v30  ;;  %2338 = vmatprep.mubr.msk.f32.mxu1 %vm2542_vm1, %v2541_v3  ;;  %v1863_v30 = vld [vmem:[%s3007_s10 + $0x18] sm:$0xff] }
 0x6eb   :  { %v2522_v31 = vpop.eup %2521  ;;  %v1270_v33 = vmul.f32 %v2520_v13, %v2512_v38  ;;  %2427 = vmatprep.subr.bf16.mxu1 %v2426_v46  ;;  %v2438_v13 = vpack.c.bf16 %v1863_v30, %v1862_v29 }
 0x6ec   :  { %v1271_v35 = vmul.f32 %v2522_v31, %v2514_v16  ;;  %v2004_v31 = vld [vmem:[%s3008_s12] sm:$0xff] }
 0x6ed   :  { %2334 = vmatmul.mubr.msk.f32.vlgmr.msra.gmra.mrb[8].mxu0 %vm560_vm3, %v1270_v33  ;;  %v2005_v33 = vld [vmem:[%s3008_s12 + $0x8] sm:$0xff] }
 0x6ee   :  { %2339 = vmatmul.mubr.msk.f32.vlgmr.msra.gmra.mrb[22].mxu1 %vm560_vm3, %v1271_v35  ;;  %2343 = vmatprep.mubr.msk.f32.mxu0 %vm2542_vm1, %v2541_v3  ;;  %v239_v3 = vld [vmem:[%s3005_s6] sm:$0xff]  ;;  %v2442_v35 = vpack.c.bf16 %v2005_v33, %v2004_v31 }
 0x6ef   :  { %2429 = vmatpush3.bf16.msra.mxu1 %v2426_v46  ;;  %v2430_v48 = vpack.c.bf16 %v240_v47, %v239_v3 }
 0x6f1   :  { %2431 = vmatprep.subr.bf16.mxu1 %v2430_v48 }
 0x718   :  { %v1264_v37 = vpop.xlane.xlu1 %1263 }
 0x719   :  { %2523 = vrcp.f32 %v1264_v37 }
 0x71c   :  { %v1502_v40 = vpop.permute.xlu1 %1501 }
 0x71d   :  { %2342 = vmatpush3.msra.mxu0 %v1502_v40 }
 0x71e   :  { %2435 = vmatprep.subr.bf16.mxu0 %v2434_v9 }
 0x723   :  { %v2524_v42 = vpop.eup %2523 }
 0x724   :  { %v1272_v43 = vmul.f32 %v2524_v42, %v2516_v23 }
 0x726   :  { %2344 = vmatmul.mubr.msk.f32.vlgmr.msra.gmra.mrb[10].mxu0 %vm560_vm3, %v1272_v43 }
 0x727   :  { %2437 = vmatpush3.bf16.msra.mxu0 %v2434_v9 }
 0x728   :  { %2439 = vmatprep.subr.bf16.mxu0 %v2438_v13 }
 0x72b   :  { %2441 = vmatpush3.bf16.msra.mxu0 %v2438_v13 }
 0x72c   :  { %2443 = vmatprep.subr.bf16.mxu0 %v2442_v35 }
 0x7bc   :  { %v1345_v49 = vpop.f32.mrb[20].mxu1 }
 0x7bd   :  { %v2330_v50 = vpop.f32.mrb[21].mxu1  ;;  %2350 = vmatprep.mubr.msk.f32.mxu1 %vm246_vm2, %v1345_v49 }
 0x7c0   :  { %v1421_v51 = vpop.f32.mrb[8].mxu0 }
 0x7c1   :  { %v1497_v52 = vpop.f32.mrb[22].mxu1  ;;  %v2335_v53 = vpop.f32.mrb[9].mxu0  ;;  %2351 = vmatmul.mubr.msk.f32.vlgmr.msra.gmra.mrb[24].mxu1 %vm246_vm2, %v1421_v51 }
 0x7c2   :  { %v2340_v54 = vpop.f32.mrb[23].mxu1  ;;  %2353 = vmatprep.mubr.msk.f32.mxu1 %vm246_vm2, %v1497_v52  ;;  %2433 = vmatpush3.bf16.msra.mxu1 %v2430_v48  ;;  %v2164_v52 = vld [vmem:[%s3009_s8] ss:$0 sm:$0xff] }
 0x7f9   :  { %v1573_v55 = vpop.f32.mrb[10].mxu0 }
 0x7fa   :  { %v2345_v56 = vpop.f32.mrb[11].mxu0  ;;  %2354 = vmatmul.mubr.msk.f32.gmra.mrb[26].mxu1 %vm246_vm2, %v1573_v55 }
 0x7fb   :  { %2360 = vmatprep.mubr.msk.f32.mxu1 %vm246_vm2, %v2814_v34  ;;  %v2165_v56 = vld [vmem:[%s3010_s9] ss:$0 sm:$0xff] }
 0x7fe   :  { %2361 = vmatmul.mubr.msk.f32.vlgmr.msra.gmra.mrb[24].mxu1 %vm246_vm2, %v2816_v36 }
 0x7ff   :  { %2363 = vmatprep.mubr.msk.f32.mxu1 %vm246_vm2, %v2818_v39 }
 0x802   :  { %2364 = vmatmul.mubr.msk.f32.gmra.mrb[26].mxu1 %vm246_vm2, %v2820_v41 }
 0x8d1   :  { %v2362_v57 = vpop.f32.mrb[24].mxu1 }
 0x8d2   :  { %v1772_v59 = vadd.f32 %v2362_v57, %v2636_v2  ;;  %v1752_v21 = vpop.f32.mrb[25].mxu1 }
 0x8d3   :  { %v1771_v60 = vadd.f32 %v1752_v21, %v2626_v0 }
 0x8d4   :  { %v2877_v34 = vadd.f32 %v2163_v58, %v1772_v59 }
 0x8d5   :  { %v2879_v61 = vadd.f32 %v2163_v58, %v1771_v60  ;;  %v2365_v36 = vpop.f32.mrb[26].mxu1 }
 0x8d6   :  { %v1762_v62 = vpop.f32.mrb[27].mxu1  ;;  %v1791_v39 = vsel %vm53_vm0, %v2877_v34, 0.0  ;;  %v1774_v41 = vadd.f32 %v2365_v36, %v2645_v5 }
 0x8d7   :  { %v1773_v63 = vadd.f32 %v1762_v62, %v2631_v1  ;;  %1792 = vadd.xlane.f32.xlu1 %v1791_v39  ;;  %v1788_v2 = vsel %vm53_vm0, %v2879_v61, 0.0 }
 0x8d8   :  { %1789 = vadd.xlane.f32.xlu0 %v1788_v2  ;;  %v2889_v0 = vadd.f32 %v2163_v58, %v1774_v41 }
 0x8d9   :  { %v2887_v4 = vadd.f32 %v2163_v58, %v1773_v63 }
 0x8da   :  { %v1797_v6 = vsel %vm53_vm0, %v2889_v0, 0.0 }
 0x8db   :  { %v1794_v26 = vsel %vm53_vm0, %v2887_v4, 0.0 }
 0x8dc   :  { %1795 = vadd.xlane.f32.xlu0 %v1794_v26 }
 0x8e0   :  { %1798 = vadd.xlane.f32.xlu0 %v1797_v6  ;;  %v2006_v6 = vld [vmem:[%s3008_s12 + $0x10] sm:$0xff] }
 0x964   :  { %v1793_v5 = vpop.xlane.xlu1 %1792 }
 0x965   :  { %v1801_v32 = vmul.f32 0.03125, %v1793_v5  ;;  %v1790_v1 = vpop.xlane.xlu0 %1789  ;;  %v2007_v5 = vld [vmem:[%s3008_s12 + $0x18] sm:$0xff] }
 0x966   :  { %v1800_v8 = vmul.f32 0.03125, %v1790_v1  ;;  %v2008_v1 = vld [vmem:[%s3008_s12 + $0x20] sm:$0xff] }
 0x967   :  { %v1805_v10 = vsub.f32 %v2877_v34, %v1801_v32  ;;  %v2446_v32 = vpack.c.bf16 %v2007_v5, %v2006_v6 }
 0x968   :  { %v1804_v11 = vsub.f32 %v2879_v61, %v1800_v8  ;;  %v2009_v8 = vld [vmem:[%s3008_s12 + $0x28] sm:$0xff] }
 0x969   :  { %v1796_v14 = vpop.xlane.xlu0 %1795  ;;  %v1809_v15 = vmul.f32 %v1805_v10, %v1805_v10 }
 0x96a   :  { %v1802_v38 = vmul.f32 0.03125, %v1796_v14  ;;  %v1808_v16 = vmul.f32 %v1804_v11, %v1804_v11  ;;  %v2011_v14 = vld [vmem:[%s3008_s12 + $0x38] sm:$0xff] }
 0x96b   :  { %v1815_v17 = vsel %vm53_vm0, %v1809_v15, 0.0 }
 0x96c   :  { %v1806_v18 = vsub.f32 %v2887_v4, %v1802_v38  ;;  %1816 = vadd.xlane.f32.xlu1 %v1815_v17  ;;  %v1812_v19 = vsel %vm53_vm0, %v1808_v16, 0.0  ;;  %v2012_v38 = vld [vmem:[%s3008_s12 + $0x40] sm:$0xff]  ;;  %v2013_v16 = vld [vmem:[%s3008_s12 + $0x48] sm:$0xff] }
 0x96d   :  { %1813 = vadd.xlane.f32.xlu0 %v1812_v19  ;;  %v1799_v20 = vpop.xlane.xlu0 %1798  ;;  %v2458_v17 = vpack.c.bf16 %v2013_v16, %v2012_v38  ;;  %v2015_v19 = vld [vmem:[%s3008_s12 + $0x58] sm:$0xff] }
 0x96e   :  { %v1803_v22 = vmul.f32 0.03125, %v1799_v20  ;;  %v1810_v23 = vmul.f32 %v1806_v18, %v1806_v18 }
 0x970   :  { %v1807_v24 = vsub.f32 %v2889_v0, %v1803_v22  ;;  %v1818_v25 = vsel %vm53_vm0, %v1810_v23, 0.0  ;;  %v2016_v22 = vld [vmem:[%s3008_s12 + $0x60] sm:$0xff]  ;;  %v2017_v23 = vld [vmem:[%s3008_s12 + $0x68] sm:$0xff] }
 0x971   :  { %1819 = vadd.xlane.f32.xlu0 %v1818_v25  ;;  %v2018_v25 = vld [vmem:[%s3008_s12 + $0x70] sm:$0xff] }
 0x972   :  { %v1811_v27 = vmul.f32 %v1807_v24, %v1807_v24 }
 0x974   :  { %v1821_v28 = vsel %vm53_vm0, %v1811_v27, 0.0  ;;  %v2019_v27 = vld [vmem:[%s3008_s12 + $0x78] sm:$0xff] }
 0x975   :  { %1822 = vadd.xlane.f32.xlu1 %v1821_v28  ;;  %v2470_v28 = vpack.c.bf16 %v2019_v27, %v2018_v25 }
 0x9f9   :  { %v1817_v37 = vpop.xlane.xlu1 %1816 }
 0x9fa   :  { %v1825_v40 = vmul.f32 0.03125, %v1817_v37  ;;  %v1814_v42 = vpop.xlane.xlu0 %1813 }
 0x9fb   :  { %v1824_v43 = vmul.f32 0.03125, %v1814_v42 }
 0x9fc   :  { %v1829_v44 = vadd.f32 1e-05, %v1825_v40 }
 0x9fd   :  { %v1828_v45 = vadd.f32 1e-05, %v1824_v43 }
 0x9fe   :  { %2525 = vrsqrt.f32 %v1829_v44  ;;  %v1820_v46 = vpop.xlane.xlu0 %1819 }
 0x9ff   :  { %2527 = vrsqrt.f32 %v1828_v45  ;;  %v1826_v3 = vmul.f32 0.03125, %v1820_v46 }
 0xa01   :  { %v1830_v47 = vadd.f32 1e-05, %v1826_v3 }
 0xa02   :  { %v1823_v48 = vpop.xlane.xlu1 %1822 }
 0xa03   :  { %2529 = vrsqrt.f32 %v1830_v47  ;;  %v1827_v49 = vmul.f32 0.03125, %v1823_v48 }
 0xa05   :  { %v1831_v50 = vadd.f32 1e-05, %v1827_v49 }
 0xa07   :  { %2531 = vrsqrt.f32 %v1831_v50 }
 0xa08   :  { %v2526_v51 = vpop.eup %2525 }
 0xa09   :  { %v2528_v53 = vpop.eup %2527  ;;  %v1837_v54 = vmul.f32 %v2526_v51, %v1805_v10  ;;  %v2450_v10 = vpack.c.bf16 %v2009_v8, %v2008_v1 }
 0xa0a   :  { %v1836_v55 = vmul.f32 %v2528_v53, %v1804_v11  ;;  %v2010_v11 = vld [vmem:[%s3008_s12 + $0x30] sm:$0xff] }
 0xa0b   :  { %v1847_v57 = vmul.f32 %v2164_v52, %v1837_v54  ;;  %v2454_v15 = vpack.c.bf16 %v2011_v14, %v2010_v11  ;;  %v2171_v11 = vld [vmem:[%s3012_s13] ss:$0 sm:$0xff] }
 0xa0c   :  { %v1846_v58 = vmul.f32 %v2164_v52, %v1836_v55 }
 0xa0d   :  { %v2530_v59 = vpop.eup %2529  ;;  %v1857_v36 = vadd.f32 %v2165_v56, %v1847_v57 }
 0xa0e   :  { %v1856_v21 = vadd.f32 %v2165_v56, %v1846_v58  ;;  %v1838_v60 = vmul.f32 %v2530_v59, %v1806_v18  ;;  %v2014_v18 = vld [vmem:[%s3008_s12 + $0x50] sm:$0xff] }
 0xa0f   :  { %v2462_v20 = vpack.c.bf16 %v2015_v19, %v2014_v18 }
 0xa10   :  { %2374 = vmatprep.mubr.msk.f32.mxu0 %vm53_vm0, %v1856_v21  ;;  %v1848_v62 = vmul.f32 %v2164_v52, %v1838_v60 }
 0xa11   :  { %v2532_v39 = vpop.eup %2531  ;;  %2375 = vmatmul.mubr.msk.f32.vlgmr.msra.gmra.mrb[12].mxu0 %vm53_vm0, %v1857_v36 }
 0xa12   :  { %v1858_v41 = vadd.f32 %v2165_v56, %v1848_v62  ;;  %v1839_v63 = vmul.f32 %v2532_v39, %v1807_v24  ;;  %2445 = vmatpush3.bf16.msra.mxu0 %v2442_v35  ;;  %v2466_v24 = vpack.c.bf16 %v2017_v23, %v2016_v22 }
 0xa13   :  { %2447 = vmatprep.subr.bf16.mxu0 %v2446_v32 }
 0xa14   :  { %2377 = vmatprep.mubr.msk.f32.mxu0 %vm53_vm0, %v1858_v41  ;;  %v1849_v2 = vmul.f32 %v2164_v52, %v1839_v63 }
 0xa16   :  { %v1859_v26 = vadd.f32 %v2165_v56, %v1849_v2  ;;  %2449 = vmatpush3.bf16.msra.mxu0 %v2446_v32 }
 0xa17   :  { %2451 = vmatprep.subr.bf16.mxu0 %v2450_v10 }
 0xa18   :  { %2378 = vmatmul.mubr.msk.f32.gmra.mrb[14].mxu0 %vm53_vm0, %v1859_v26 }
 0xa1a   :  { %2453 = vmatpush3.bf16.msra.mxu0 %v2450_v10 }
 0xa1b   :  { %2455 = vmatprep.subr.bf16.mxu0 %v2454_v15 }
 0xa1e   :  { %2457 = vmatpush3.bf16.msra.mxu0 %v2454_v15 }
 0xa1f   :  { %2459 = vmatprep.subr.bf16.mxu0 %v2458_v17 }
 0xa22   :  { %2461 = vmatpush3.bf16.msra.mxu0 %v2458_v17 }
 0xa23   :  { %2463 = vmatprep.subr.bf16.mxu0 %v2462_v20 }
 0xa26   :  { %2465 = vmatpush3.bf16.msra.mxu0 %v2462_v20 }
 0xa27   :  { %2467 = vmatprep.subr.bf16.mxu0 %v2466_v24 }
 0xa2a   :  { %2469 = vmatpush3.bf16.msra.mxu0 %v2466_v24 }
 0xa2b   :  { %2471 = vmatprep.subr.bf16.mxu0 %v2470_v28 }
 0xa2e   :  { %2473 = vmatpush3.bf16.msra.mxu0 %v2470_v28 }
 0xae4   :  { %v2376_v12 = vpop.f32.mrb[12].mxu0 }
 0xae5   :  { %v1955_v9 = vadd.f32 %v2376_v12, %v2166_v7  ;;  %v1949_v29 = vpop.f32.mrb[13].mxu0 }
 0xae6   :  { %v1950_v30 = vadd.f32 %v2166_v7, %v1949_v29 }
 0xae7   :  { %v1973_v13 = vmul.f32 0.044715, %v1955_v9  ;;  %v1969_v39 = vmul.f32 0.5, %v1955_v9 }
 0xae8   :  { %v1972_v31 = vmul.f32 0.044715, %v1950_v30  ;;  %v1968_v36 = vmul.f32 0.5, %v1950_v30 }
 0xae9   :  { %v1977_v33 = vmul.f32 %v1973_v13, %v1955_v9 }
 0xaea   :  { %v1976_v35 = vmul.f32 %v1972_v31, %v1950_v30 }
 0xaeb   :  { %v1981_v37 = vmul.f32 %v1977_v33, %v1955_v9  ;;  %v2379_v40 = vpop.f32.mrb[14].mxu0 }
 0xaec   :  { %v1965_v42 = vadd.f32 %v2379_v40, %v2166_v7  ;;  %v1959_v43 = vpop.f32.mrb[15].mxu0  ;;  %v1980_v44 = vmul.f32 %v1976_v35, %v1950_v30 }
 0xaed   :  { %v1985_v45 = vadd.f32 %v1981_v37, %v1955_v9  ;;  %v1960_v46 = vadd.f32 %v2166_v7, %v1959_v43 }
 0xaee   :  { %v1975_v3 = vmul.f32 0.044715, %v1965_v42  ;;  %v1984_v47 = vadd.f32 %v1980_v44, %v1950_v30  ;;  %v1971_v1 = vmul.f32 0.5, %v1965_v42 }
 0xaef   :  { %v1989_v48 = vmul.f32 0.7978846, %v1985_v45  ;;  %v1974_v49 = vmul.f32 0.044715, %v1960_v46  ;;  %v1970_v5 = vmul.f32 0.5, %v1960_v46 }
 0xaf0   :  { %v1979_v50 = vmul.f32 %v1975_v3, %v1965_v42  ;;  %v1988_v51 = vmul.f32 0.7978846, %v1984_v47 }
 0xaf1   :  { %2533 = vtanh.f32 %v1989_v48  ;;  %v1978_v52 = vmul.f32 %v1974_v49, %v1960_v46 }
 0xaf2   :  { %2535 = vtanh.f32 %v1988_v51  ;;  %v1983_v53 = vmul.f32 %v1979_v50, %v1965_v42 }
 0xaf3   :  { %v1982_v54 = vmul.f32 %v1978_v52, %v1960_v46 }
 0xaf4   :  { %v1987_v55 = vadd.f32 %v1983_v53, %v1965_v42 }
 0xaf5   :  { %v1986_v56 = vadd.f32 %v1982_v54, %v1960_v46 }
 0xaf6   :  { %v1991_v57 = vmul.f32 0.7978846, %v1987_v55 }
 0xaf7   :  { %v1990_v58 = vmul.f32 0.7978846, %v1986_v56 }
 0xaf8   :  { %2537 = vtanh.f32 %v1991_v57 }
 0xaf9   :  { %2539 = vtanh.f32 %v1990_v58 }
 0xafb   :  { %v2534_v59 = vpop.eup %2533 }
 0xafc   :  { %v2536_v21 = vpop.eup %2535  ;;  %v1997_v60 = vadd.f32 1.0, %v2534_v59 }
 0xafd   :  { %v1996_v62 = vadd.f32 1.0, %v2536_v21 }
 0xafe   :  { %v2001_v63 = vmul.f32 %v1997_v60, %v1969_v39 }
 0xaff   :  { %v2000_v41 = vmul.f32 %v1996_v62, %v1968_v36 }
 0xb01   :  { %2412 = vmatprep.mubr.f32.mxu0 %v2000_v41 }
 0xb02   :  { %v2538_v2 = vpop.eup %2537  ;;  %2413 = vmatmul.mubr.f32.vlgmr.msra.gmra.mrb[16].mxu0 %v2001_v63 }
 0xb03   :  { %v2540_v26 = vpop.eup %2539  ;;  %v1999_v6 = vadd.f32 1.0, %v2538_v2 }
 0xb04   :  { %v1998_v32 = vadd.f32 1.0, %v2540_v26 }
 0xb05   :  { %v2003_v10 = vmul.f32 %v1999_v6, %v1971_v1 }
 0xb06   :  { %v2002_v8 = vmul.f32 %v1998_v32, %v1970_v5 }
 0xb08   :  { %2415 = vmatprep.mubr.f32.mxu0 %v2002_v8 }
 0xb09   :  { %2416 = vmatmul.mubr.f32.gmra.mrb[18].mxu0 %v2003_v10 }
 0xbd5   :  { %v2414_v14 = vpop.f32.mrb[16].mxu0 }
 0xbd6   :  { %v2099_v15 = vadd.f32 %v2414_v14, %v2171_v11  ;;  %v2093_v38 = vpop.f32.mrb[17].mxu0 }
 0xbd7   :  { %v2094_v16 = vadd.f32 %v2171_v11, %v2093_v38 }
 0xbd8   :  { %v2113_v17 = vadd.f32 %v2099_v15, %v2877_v34 }
 0xbd9   :  { %v2112_v18 = vadd.f32 %v2094_v16, %v2879_v61 }
 0xbda   :  { %2117 = vst.msk [vmem:[%s3013_s14 + $0x8] sm:$0xff] %vm53_vm0, %v2113_v17 }
 0xbdb   :  { %2116 = vst.msk [vmem:[%s3013_s14] sm:$0xff] %vm53_vm0, %v2112_v18 }
 0xbdc   :  { %v2417_v19 = vpop.f32.mrb[18].mxu0 }
 0xbdd   :  { %v2109_v20 = vadd.f32 %v2417_v19, %v2171_v11  ;;  %v2103_v22 = vpop.f32.mrb[19].mxu0 }
 0xbde   :  { %v2104_v23 = vadd.f32 %v2171_v11, %v2103_v22 }
 0xbdf   :  { %v2115_v24 = vadd.f32 %v2109_v20, %v2889_v0 }
 0xbe0   :  { %v2114_v34 = vadd.f32 %v2104_v23, %v2887_v4 }
 0xbe1   :  { %2119 = vst.msk [vmem:[%s3013_s14 + $0x18] sm:$0xff] %vm53_vm0, %v2115_v24 }
 0xbe2   :  { %2118 = vst.msk [vmem:[%s3013_s14 + $0x10] sm:$0xff] %vm53_vm0, %v2114_v34 }

</bundles_post_ra>
